<compile_context>
chip_gen: v6e
topology: v6e:2x2x1
jax: 0.10.0
libtpu: 0.0.40
codegen_flags: <defaults>
</compile_context>

<pallas_src>
import functools

import jax
import jax.numpy as jnp
from jax import lax
from jax.experimental import pallas as pl
from jax.experimental.pallas import tpu as pltpu


def _affine_sample_kernel(params_ref, xn_ref, yn_ref, x_ref, o_ref, *, H, W):
    """One sample: bilinear grid_sample under a per-sample affine grid.

    params_ref : (N, 8) f32 in SMEM -> [a00, a01, a02, a10, a11, a12, sx, sy]
    xn_ref/yn_ref : (1, HW) f32 base output grid (normalized coords, x / y)
    x_ref / o_ref : (C, HW) image block for this sample (leading N squeezed).
    """
    n = pl.program_id(0)
    a00 = params_ref[n, 0]
    a01 = params_ref[n, 1]
    a02 = params_ref[n, 2]
    a10 = params_ref[n, 3]
    a11 = params_ref[n, 4]
    a12 = params_ref[n, 5]
    sx = params_ref[n, 6]   # -1.0 if LR flip for this sample else +1.0
    sy = params_ref[n, 7]   # -1.0 if UD flip for this sample else +1.0

    HW = H * W
    xn = xn_ref[...]        # (1, HW)
    yn = yn_ref[...]        # (1, HW)

    # affine_grid: sampling location (normalized) for every output pixel.
    # Flipping the input image == negating the corresponding grid coordinate.
    gx = sx * (a00 * xn + a01 * yn + a02)
    gy = sy * (a10 * xn + a11 * yn + a12)

    # Unnormalize, align_corners=False.
    ix = ((gx + 1.0) * W - 1.0) * 0.5
    iy = ((gy + 1.0) * H - 1.0) * 0.5

    ix0 = jnp.floor(ix)
    iy0 = jnp.floor(iy)
    ix1 = ix0 + 1.0
    iy1 = iy0 + 1.0
    wx1 = ix - ix0
    wx0 = 1.0 - wx1
    wy1 = iy - iy0
    wy0 = 1.0 - wy1

    # Input-pixel index along axis 0 (q); output pixels run on the lane axis.
    q = lax.broadcasted_iota(jnp.int32, (HW, HW), 0)

    def corner(cx, cy, w):
        valid = (cx >= 0.0) & (cx <= W - 1.0) & (cy >= 0.0) & (cy <= H - 1.0)
        w = jnp.where(valid, w, 0.0)                       # padding_mode='zeros'
        idx = (jnp.clip(cy, 0.0, H - 1.0) * W
               + jnp.clip(cx, 0.0, W - 1.0)).astype(jnp.int32)   # (1, HW)
        return jnp.where(q == idx, w, 0.0)                 # (HW, HW)

    m = (corner(ix0, iy0, wy0 * wx0) + corner(ix1, iy0, wy0 * wx1)
         + corner(ix0, iy1, wy1 * wx0) + corner(ix1, iy1, wy1 * wx1))

    img = x_ref[...].astype(jnp.float32)                   # (C, HW)
    out = jnp.dot(img, m, preferred_element_type=jnp.float32)   # MXU
    o_ref[...] = out.astype(o_ref.dtype)


def affine_grid_sample(x, params):
    """Bilinear grid_sample of NCHW `x` under per-sample affine params (N, 8)."""
    N, C, H, W = x.shape
    HW = H * W
    x2d = x.reshape(N, C, HW)                              # lane-dense layout

    # Base output grid (align_corners=False pixel centers), shared by samples.
    xw = (2.0 * jnp.arange(W, dtype=jnp.float32) + 1.0) / W - 1.0
    yh = (2.0 * jnp.arange(H, dtype=jnp.float32) + 1.0) / H - 1.0
    xn = jnp.tile(xw, H).reshape(1, HW)
    yn = jnp.repeat(yh, W).reshape(1, HW)

    kernel = functools.partial(_affine_sample_kernel, H=H, W=W)
    out2d = pl.pallas_call(
        kernel,
        out_shape=jax.ShapeDtypeStruct((N, C, HW), x.dtype),
        grid=(N,),
        in_specs=[
            pl.BlockSpec(memory_space=pltpu.SMEM),             # params (N, 8)
            pl.BlockSpec((1, HW), lambda n: (0, 0)),           # xn
            pl.BlockSpec((1, HW), lambda n: (0, 0)),           # yn
            pl.BlockSpec((None, C, HW), lambda n: (n, 0, 0)),  # x sample
        ],
        out_specs=pl.BlockSpec((None, C, HW), lambda n: (n, 0, 0)),
        compiler_params=pltpu.CompilerParams(
            dimension_semantics=("parallel",)),
    )(params, xn, yn, x2d)
    return out2d.reshape(N, C, H, W)


def _affine_params(key, n, *, flip_lr=True, flip_ud=True, theta=0.0,
                   tr_x=0.0, tr_y=0.0):
    """Per-sample random affine params matching Affine_TF.m_affine + flips."""
    theta_rng = 2.0 * theta          # module stores theta * 2 / tr_* * 2
    tr_x_rng = 2.0 * tr_x
    tr_y_rng = 2.0 * tr_y

    k_rg, k_ang, k_tg, k_tx, k_ty, k_lr, k_ud = jax.random.split(key, 7)

    if theta != 0:
        rot_gate = jax.random.uniform(k_rg, (n,)) > 0.5
    else:
        rot_gate = jnp.zeros((n,), dtype=bool)
    ang = jnp.pi / 180.0 * ((jax.random.uniform(k_ang, (n,)) - 0.5) * theta_rng)
    ang = jnp.where(rot_gate, ang, 0.0)
    ca, sa = jnp.cos(ang), jnp.sin(ang)

    if (tr_x != 0) and (tr_y != 0):
        tr_gate = jax.random.uniform(k_tg, (n,)) > 0.5
    else:
        tr_gate = jnp.zeros((n,), dtype=bool)
    tx = jnp.where(tr_gate, (jax.random.uniform(k_tx, (n,)) - 0.5) * tr_x_rng, 0.0)
    ty = jnp.where(tr_gate, (jax.random.uniform(k_ty, (n,)) - 0.5) * tr_y_rng, 0.0)

    one = jnp.ones((n,), jnp.float32)
    sx = jnp.where(jax.random.uniform(k_lr, (n,)) > 0.5, -one, one) if flip_lr else one
    sy = jnp.where(jax.random.uniform(k_ud, (n,)) > 0.5, -one, one) if flip_ud else one

    return jnp.stack([ca, -sa, tx, sa, ca, ty, sx, sy], axis=1).astype(jnp.float32)


def affine_tf_forward(x, key, *, flip_lr=True, flip_ud=True, theta=0.0,
                      tr_x=0.0, tr_y=0.0):
    """Reproduces Affine_TF.forward (with_flow=False): random per-sample LR/UD
    flips, random rotation/translation affine matrix, then bilinear
    grid_sample with padding_mode='zeros', align_corners=False."""
    params = _affine_params(key, x.shape[0], flip_lr=flip_lr, flip_ud=flip_ud,
                            theta=theta, tr_x=tr_x, tr_y=tr_y)
    return affine_grid_sample(x, params)


def _grid_sample_ref(x, params):
    """Pure-JAX reference for the sampling math (correctness cross-check)."""
    N, C, H, W = x.shape
    xw = (2.0 * jnp.arange(W, dtype=jnp.float32) + 1.0) / W - 1.0
    yh = (2.0 * jnp.arange(H, dtype=jnp.float32) + 1.0) / H - 1.0
    xn = jnp.broadcast_to(xw[None, :], (H, W))
    yn = jnp.broadcast_to(yh[:, None], (H, W))

    def one(xi, p):
        gx = p[6] * (p[0] * xn + p[1] * yn + p[2])
        gy = p[7] * (p[3] * xn + p[4] * yn + p[5])
        ix = ((gx + 1.0) * W - 1.0) * 0.5
        iy = ((gy + 1.0) * H - 1.0) * 0.5
        ix0 = jnp.floor(ix)
        iy0 = jnp.floor(iy)
        out = jnp.zeros((C, H, W), jnp.float32)
        for dy in (0.0, 1.0):
            for dx in (0.0, 1.0):
                cx = ix0 + dx
                cy = iy0 + dy
                w = (1.0 - jnp.abs(ix - cx)) * (1.0 - jnp.abs(iy - cy))
                valid = (cx >= 0) & (cx <= W - 1) & (cy >= 0) & (cy <= H - 1)
                w = jnp.where(valid, w, 0.0)
                cxi = jnp.clip(cx, 0, W - 1).astype(jnp.int32)
                cyi = jnp.clip(cy, 0, H - 1).astype(jnp.int32)
                out = out + w[None] * xi[:, cyi, cxi]
        return out

    return jax.vmap(one)(x.astype(jnp.float32), params).astype(x.dtype)


if __name__ == "__main__":
    key = jax.random.PRNGKey(0)
    k_x, k_aug = jax.random.split(key)

    N, C, H, W = 2, 4, 16, 16
    x = jax.random.normal(k_x, (N, C, H, W), dtype=jnp.float32)

    kwargs = dict(flip_lr=True, flip_ud=True, theta=30.0, tr_x=0.1, tr_y=0.1)
    y = affine_tf_forward(x, k_aug, **kwargs)
    y = jax.block_until_ready(y)

    # Cross-check the Pallas grid_sample against a pure-JAX reference using the
    # exact same per-sample affine parameters (same key).
    params = _affine_params(k_aug, N, **kwargs)
    y_ref = _grid_sample_ref(x, params)

    assert y.shape == x.shape and y.dtype == x.dtype
    assert bool(jnp.all(jnp.isfinite(y)))
    assert bool(jnp.allclose(y, y_ref, atol=5e-2, rtol=1e-2)), float(
        jnp.max(jnp.abs(y - y_ref)))
    print("KERNEL_OK")
</pallas_src>

<mosaic_0001>
module attributes {stable_mosaic.version = 11 : i64} {
  func.func @_affine_sample_kernel(%arg0: i32, %arg1: memref<2x8xf32, #tpu.memory_space<smem>>, %arg2: memref<1x256xf32, #tpu.memory_space<vmem>>, %arg3: memref<1x256xf32, #tpu.memory_space<vmem>>, %arg4: memref<1x4x256xf32, #tpu.memory_space<vmem>>, %arg5: memref<1x4x256xf32, #tpu.memory_space<vmem>>) attributes {dimension_semantics = [#tpu.dimension_semantics<parallel>], iteration_bounds = array<i64: 2>, scalar_prefetch = 0 : i64, scratch_operands = 0 : i64, tpu.core_type = #tpu.core_type<tc>, window_params = [{transform_indices = @transform_0, window_bounds = array<i64: 2, 8>}, {pipeline_mode = #tpu.pipeline_mode<synchronous>, transform_indices = @transform_1, window_bounds = array<i64: 1, 256>}, {pipeline_mode = #tpu.pipeline_mode<synchronous>, transform_indices = @transform_2, window_bounds = array<i64: 1, 256>}, {transform_indices = @transform_3, window_bounds = array<i64: 1, 4, 256>}, {transform_indices = @transform_4, window_bounds = array<i64: 1, 4, 256>}]} {
    %0 = arith.index_cast %arg0 : i32 to index
    %c0 = arith.constant 0 : index
    %1 = memref.load %arg1[%0, %c0] : memref<2x8xf32, #tpu.memory_space<smem>>
    %2 = arith.index_cast %arg0 : i32 to index
    %c1 = arith.constant 1 : index
    %3 = memref.load %arg1[%2, %c1] : memref<2x8xf32, #tpu.memory_space<smem>>
    %4 = arith.index_cast %arg0 : i32 to index
    %c2 = arith.constant 2 : index
    %5 = memref.load %arg1[%4, %c2] : memref<2x8xf32, #tpu.memory_space<smem>>
    %6 = arith.index_cast %arg0 : i32 to index
    %c3 = arith.constant 3 : index
    %7 = memref.load %arg1[%6, %c3] : memref<2x8xf32, #tpu.memory_space<smem>>
    %8 = arith.index_cast %arg0 : i32 to index
    %c4 = arith.constant 4 : index
    %9 = memref.load %arg1[%8, %c4] : memref<2x8xf32, #tpu.memory_space<smem>>
    %10 = arith.index_cast %arg0 : i32 to index
    %c5 = arith.constant 5 : index
    %11 = memref.load %arg1[%10, %c5] : memref<2x8xf32, #tpu.memory_space<smem>>
    %12 = arith.index_cast %arg0 : i32 to index
    %c6 = arith.constant 6 : index
    %13 = memref.load %arg1[%12, %c6] : memref<2x8xf32, #tpu.memory_space<smem>>
    %14 = arith.index_cast %arg0 : i32 to index
    %c7 = arith.constant 7 : index
    %15 = memref.load %arg1[%14, %c7] : memref<2x8xf32, #tpu.memory_space<smem>>
    %c0_0 = arith.constant 0 : index
    %c0_1 = arith.constant 0 : index
    %16 = vector.load %arg2[%c0_0, %c0_1] : memref<1x256xf32, #tpu.memory_space<vmem>>, vector<1x256xf32>
    %c0_2 = arith.constant 0 : index
    %c0_3 = arith.constant 0 : index
    %17 = vector.load %arg3[%c0_2, %c0_3] : memref<1x256xf32, #tpu.memory_space<vmem>>, vector<1x256xf32>
    %18 = vector.broadcast %1 : f32 to vector<1x256xf32>
    %19 = arith.mulf %18, %16 : vector<1x256xf32>
    %20 = vector.broadcast %3 : f32 to vector<1x256xf32>
    %21 = arith.mulf %20, %17 : vector<1x256xf32>
    %22 = arith.addf %19, %21 : vector<1x256xf32>
    %23 = vector.broadcast %5 : f32 to vector<1x256xf32>
    %24 = arith.addf %22, %23 : vector<1x256xf32>
    %25 = vector.broadcast %13 : f32 to vector<1x256xf32>
    %26 = arith.mulf %25, %24 : vector<1x256xf32>
    %27 = vector.broadcast %7 : f32 to vector<1x256xf32>
    %28 = arith.mulf %27, %16 : vector<1x256xf32>
    %29 = vector.broadcast %9 : f32 to vector<1x256xf32>
    %30 = arith.mulf %29, %17 : vector<1x256xf32>
    %31 = arith.addf %28, %30 : vector<1x256xf32>
    %32 = vector.broadcast %11 : f32 to vector<1x256xf32>
    %33 = arith.addf %31, %32 : vector<1x256xf32>
    %34 = vector.broadcast %15 : f32 to vector<1x256xf32>
    %35 = arith.mulf %34, %33 : vector<1x256xf32>
    %cst = arith.constant 1.000000e+00 : f32
    %36 = vector.broadcast %cst : f32 to vector<1x256xf32>
    %37 = arith.addf %26, %36 : vector<1x256xf32>
    %cst_4 = arith.constant 1.600000e+01 : f32
    %38 = vector.broadcast %cst_4 : f32 to vector<1x256xf32>
    %39 = arith.mulf %37, %38 : vector<1x256xf32>
    %cst_5 = arith.constant 1.000000e+00 : f32
    %40 = vector.broadcast %cst_5 : f32 to vector<1x256xf32>
    %41 = arith.subf %39, %40 : vector<1x256xf32>
    %cst_6 = arith.constant 5.000000e-01 : f32
    %42 = vector.broadcast %cst_6 : f32 to vector<1x256xf32>
    %43 = arith.mulf %41, %42 : vector<1x256xf32>
    %cst_7 = arith.constant 1.000000e+00 : f32
    %44 = vector.broadcast %cst_7 : f32 to vector<1x256xf32>
    %45 = arith.addf %35, %44 : vector<1x256xf32>
    %cst_8 = arith.constant 1.600000e+01 : f32
    %46 = vector.broadcast %cst_8 : f32 to vector<1x256xf32>
    %47 = arith.mulf %45, %46 : vector<1x256xf32>
    %cst_9 = arith.constant 1.000000e+00 : f32
    %48 = vector.broadcast %cst_9 : f32 to vector<1x256xf32>
    %49 = arith.subf %47, %48 : vector<1x256xf32>
    %cst_10 = arith.constant 5.000000e-01 : f32
    %50 = vector.broadcast %cst_10 : f32 to vector<1x256xf32>
    %51 = arith.mulf %49, %50 : vector<1x256xf32>
    %52 = math.floor %43 : vector<1x256xf32>
    %53 = math.floor %51 : vector<1x256xf32>
    %cst_11 = arith.constant 1.000000e+00 : f32
    %54 = vector.broadcast %cst_11 : f32 to vector<1x256xf32>
    %55 = arith.addf %52, %54 : vector<1x256xf32>
    %cst_12 = arith.constant 1.000000e+00 : f32
    %56 = vector.broadcast %cst_12 : f32 to vector<1x256xf32>
    %57 = arith.addf %53, %56 : vector<1x256xf32>
    %58 = arith.subf %43, %52 : vector<1x256xf32>
    %cst_13 = arith.constant 1.000000e+00 : f32
    %59 = vector.broadcast %cst_13 : f32 to vector<1x256xf32>
    %60 = arith.subf %59, %58 : vector<1x256xf32>
    %61 = arith.subf %51, %53 : vector<1x256xf32>
    %cst_14 = arith.constant 1.000000e+00 : f32
    %62 = vector.broadcast %cst_14 : f32 to vector<1x256xf32>
    %63 = arith.subf %62, %61 : vector<1x256xf32>
    %64 = tpu.iota {dimensions = array<i32: 0>} : vector<256x256xi32>
    %65 = arith.mulf %63, %60 : vector<1x256xf32>
    %cst_15 = arith.constant 0.000000e+00 : f32
    %66 = vector.broadcast %cst_15 : f32 to vector<1x256xf32>
    %67 = arith.cmpf oge, %52, %66 : vector<1x256xf32>
    %cst_16 = arith.constant 1.500000e+01 : f32
    %68 = vector.broadcast %cst_16 : f32 to vector<1x256xf32>
    %69 = arith.cmpf ole, %52, %68 : vector<1x256xf32>
    %70 = arith.andi %67, %69 : vector<1x256xi1>
    %cst_17 = arith.constant 0.000000e+00 : f32
    %71 = vector.broadcast %cst_17 : f32 to vector<1x256xf32>
    %72 = arith.cmpf oge, %53, %71 : vector<1x256xf32>
    %73 = arith.andi %70, %72 : vector<1x256xi1>
    %cst_18 = arith.constant 1.500000e+01 : f32
    %74 = vector.broadcast %cst_18 : f32 to vector<1x256xf32>
    %75 = arith.cmpf ole, %53, %74 : vector<1x256xf32>
    %76 = arith.andi %73, %75 : vector<1x256xi1>
    %cst_19 = arith.constant 0.000000e+00 : f32
    %77 = vector.broadcast %cst_19 : f32 to vector<1x256xf32>
    %78 = arith.select %76, %65, %77 : vector<1x256xi1>, vector<1x256xf32>
    %cst_20 = arith.constant 0.000000e+00 : f32
    %cst_21 = arith.constant 1.500000e+01 : f32
    %79 = vector.broadcast %cst_20 : f32 to vector<1x256xf32>
    %80 = arith.maximumf %79, %53 : vector<1x256xf32>
    %81 = vector.broadcast %cst_21 : f32 to vector<1x256xf32>
    %82 = arith.minimumf %81, %80 : vector<1x256xf32>
    %cst_22 = arith.constant 1.600000e+01 : f32
    %83 = vector.broadcast %cst_22 : f32 to vector<1x256xf32>
    %84 = arith.mulf %82, %83 : vector<1x256xf32>
    %cst_23 = arith.constant 0.000000e+00 : f32
    %cst_24 = arith.constant 1.500000e+01 : f32
    %85 = vector.broadcast %cst_23 : f32 to vector<1x256xf32>
    %86 = arith.maximumf %85, %52 : vector<1x256xf32>
    %87 = vector.broadcast %cst_24 : f32 to vector<1x256xf32>
    %88 = arith.minimumf %87, %86 : vector<1x256xf32>
    %89 = arith.addf %84, %88 : vector<1x256xf32>
    %90 = arith.fptosi %89 : vector<1x256xf32> to vector<1x256xi32>
    %91 = vector.broadcast %90 : vector<1x256xi32> to vector<256x256xi32>
    %92 = arith.cmpi eq, %64, %91 : vector<256x256xi32>
    %cst_25 = arith.constant 0.000000e+00 : f32
    %93 = vector.shape_cast %78 : vector<1x256xf32> to vector<1x256xf32>
    %94 = vector.broadcast %93 : vector<1x256xf32> to vector<256x256xf32>
    %95 = vector.broadcast %cst_25 : f32 to vector<256x256xf32>
    %96 = arith.select %92, %94, %95 : vector<256x256xi1>, vector<256x256xf32>
    %97 = arith.mulf %63, %58 : vector<1x256xf32>
    %cst_26 = arith.constant 0.000000e+00 : f32
    %98 = vector.broadcast %cst_26 : f32 to vector<1x256xf32>
    %99 = arith.cmpf oge, %55, %98 : vector<1x256xf32>
    %cst_27 = arith.constant 1.500000e+01 : f32
    %100 = vector.broadcast %cst_27 : f32 to vector<1x256xf32>
    %101 = arith.cmpf ole, %55, %100 : vector<1x256xf32>
    %102 = arith.andi %99, %101 : vector<1x256xi1>
    %cst_28 = arith.constant 0.000000e+00 : f32
    %103 = vector.broadcast %cst_28 : f32 to vector<1x256xf32>
    %104 = arith.cmpf oge, %53, %103 : vector<1x256xf32>
    %105 = arith.andi %102, %104 : vector<1x256xi1>
    %cst_29 = arith.constant 1.500000e+01 : f32
    %106 = vector.broadcast %cst_29 : f32 to vector<1x256xf32>
    %107 = arith.cmpf ole, %53, %106 : vector<1x256xf32>
    %108 = arith.andi %105, %107 : vector<1x256xi1>
    %cst_30 = arith.constant 0.000000e+00 : f32
    %109 = vector.broadcast %cst_30 : f32 to vector<1x256xf32>
    %110 = arith.select %108, %97, %109 : vector<1x256xi1>, vector<1x256xf32>
    %cst_31 = arith.constant 0.000000e+00 : f32
    %cst_32 = arith.constant 1.500000e+01 : f32
    %111 = vector.broadcast %cst_31 : f32 to vector<1x256xf32>
    %112 = arith.maximumf %111, %53 : vector<1x256xf32>
    %113 = vector.broadcast %cst_32 : f32 to vector<1x256xf32>
    %114 = arith.minimumf %113, %112 : vector<1x256xf32>
    %cst_33 = arith.constant 1.600000e+01 : f32
    %115 = vector.broadcast %cst_33 : f32 to vector<1x256xf32>
    %116 = arith.mulf %114, %115 : vector<1x256xf32>
    %cst_34 = arith.constant 0.000000e+00 : f32
    %cst_35 = arith.constant 1.500000e+01 : f32
    %117 = vector.broadcast %cst_34 : f32 to vector<1x256xf32>
    %118 = arith.maximumf %117, %55 : vector<1x256xf32>
    %119 = vector.broadcast %cst_35 : f32 to vector<1x256xf32>
    %120 = arith.minimumf %119, %118 : vector<1x256xf32>
    %121 = arith.addf %116, %120 : vector<1x256xf32>
    %122 = arith.fptosi %121 : vector<1x256xf32> to vector<1x256xi32>
    %123 = vector.broadcast %122 : vector<1x256xi32> to vector<256x256xi32>
    %124 = arith.cmpi eq, %64, %123 : vector<256x256xi32>
    %cst_36 = arith.constant 0.000000e+00 : f32
    %125 = vector.shape_cast %110 : vector<1x256xf32> to vector<1x256xf32>
    %126 = vector.broadcast %125 : vector<1x256xf32> to vector<256x256xf32>
    %127 = vector.broadcast %cst_36 : f32 to vector<256x256xf32>
    %128 = arith.select %124, %126, %127 : vector<256x256xi1>, vector<256x256xf32>
    %129 = arith.addf %96, %128 : vector<256x256xf32>
    %130 = arith.mulf %61, %60 : vector<1x256xf32>
    %cst_37 = arith.constant 0.000000e+00 : f32
    %131 = vector.broadcast %cst_37 : f32 to vector<1x256xf32>
    %132 = arith.cmpf oge, %52, %131 : vector<1x256xf32>
    %cst_38 = arith.constant 1.500000e+01 : f32
    %133 = vector.broadcast %cst_38 : f32 to vector<1x256xf32>
    %134 = arith.cmpf ole, %52, %133 : vector<1x256xf32>
    %135 = arith.andi %132, %134 : vector<1x256xi1>
    %cst_39 = arith.constant 0.000000e+00 : f32
    %136 = vector.broadcast %cst_39 : f32 to vector<1x256xf32>
    %137 = arith.cmpf oge, %57, %136 : vector<1x256xf32>
    %138 = arith.andi %135, %137 : vector<1x256xi1>
    %cst_40 = arith.constant 1.500000e+01 : f32
    %139 = vector.broadcast %cst_40 : f32 to vector<1x256xf32>
    %140 = arith.cmpf ole, %57, %139 : vector<1x256xf32>
    %141 = arith.andi %138, %140 : vector<1x256xi1>
    %cst_41 = arith.constant 0.000000e+00 : f32
    %142 = vector.broadcast %cst_41 : f32 to vector<1x256xf32>
    %143 = arith.select %141, %130, %142 : vector<1x256xi1>, vector<1x256xf32>
    %cst_42 = arith.constant 0.000000e+00 : f32
    %cst_43 = arith.constant 1.500000e+01 : f32
    %144 = vector.broadcast %cst_42 : f32 to vector<1x256xf32>
    %145 = arith.maximumf %144, %57 : vector<1x256xf32>
    %146 = vector.broadcast %cst_43 : f32 to vector<1x256xf32>
    %147 = arith.minimumf %146, %145 : vector<1x256xf32>
    %cst_44 = arith.constant 1.600000e+01 : f32
    %148 = vector.broadcast %cst_44 : f32 to vector<1x256xf32>
    %149 = arith.mulf %147, %148 : vector<1x256xf32>
    %cst_45 = arith.constant 0.000000e+00 : f32
    %cst_46 = arith.constant 1.500000e+01 : f32
    %150 = vector.broadcast %cst_45 : f32 to vector<1x256xf32>
    %151 = arith.maximumf %150, %52 : vector<1x256xf32>
    %152 = vector.broadcast %cst_46 : f32 to vector<1x256xf32>
    %153 = arith.minimumf %152, %151 : vector<1x256xf32>
    %154 = arith.addf %149, %153 : vector<1x256xf32>
    %155 = arith.fptosi %154 : vector<1x256xf32> to vector<1x256xi32>
    %156 = vector.broadcast %155 : vector<1x256xi32> to vector<256x256xi32>
    %157 = arith.cmpi eq, %64, %156 : vector<256x256xi32>
    %cst_47 = arith.constant 0.000000e+00 : f32
    %158 = vector.shape_cast %143 : vector<1x256xf32> to vector<1x256xf32>
    %159 = vector.broadcast %158 : vector<1x256xf32> to vector<256x256xf32>
    %160 = vector.broadcast %cst_47 : f32 to vector<256x256xf32>
    %161 = arith.select %157, %159, %160 : vector<256x256xi1>, vector<256x256xf32>
    %162 = arith.addf %129, %161 : vector<256x256xf32>
    %163 = arith.mulf %61, %58 : vector<1x256xf32>
    %cst_48 = arith.constant 0.000000e+00 : f32
    %164 = vector.broadcast %cst_48 : f32 to vector<1x256xf32>
    %165 = arith.cmpf oge, %55, %164 : vector<1x256xf32>
    %cst_49 = arith.constant 1.500000e+01 : f32
    %166 = vector.broadcast %cst_49 : f32 to vector<1x256xf32>
    %167 = arith.cmpf ole, %55, %166 : vector<1x256xf32>
    %168 = arith.andi %165, %167 : vector<1x256xi1>
    %cst_50 = arith.constant 0.000000e+00 : f32
    %169 = vector.broadcast %cst_50 : f32 to vector<1x256xf32>
    %170 = arith.cmpf oge, %57, %169 : vector<1x256xf32>
    %171 = arith.andi %168, %170 : vector<1x256xi1>
    %cst_51 = arith.constant 1.500000e+01 : f32
    %172 = vector.broadcast %cst_51 : f32 to vector<1x256xf32>
    %173 = arith.cmpf ole, %57, %172 : vector<1x256xf32>
    %174 = arith.andi %171, %173 : vector<1x256xi1>
    %cst_52 = arith.constant 0.000000e+00 : f32
    %175 = vector.broadcast %cst_52 : f32 to vector<1x256xf32>
    %176 = arith.select %174, %163, %175 : vector<1x256xi1>, vector<1x256xf32>
    %cst_53 = arith.constant 0.000000e+00 : f32
    %cst_54 = arith.constant 1.500000e+01 : f32
    %177 = vector.broadcast %cst_53 : f32 to vector<1x256xf32>
    %178 = arith.maximumf %177, %57 : vector<1x256xf32>
    %179 = vector.broadcast %cst_54 : f32 to vector<1x256xf32>
    %180 = arith.minimumf %179, %178 : vector<1x256xf32>
    %cst_55 = arith.constant 1.600000e+01 : f32
    %181 = vector.broadcast %cst_55 : f32 to vector<1x256xf32>
    %182 = arith.mulf %180, %181 : vector<1x256xf32>
    %cst_56 = arith.constant 0.000000e+00 : f32
    %cst_57 = arith.constant 1.500000e+01 : f32
    %183 = vector.broadcast %cst_56 : f32 to vector<1x256xf32>
    %184 = arith.maximumf %183, %55 : vector<1x256xf32>
    %185 = vector.broadcast %cst_57 : f32 to vector<1x256xf32>
    %186 = arith.minimumf %185, %184 : vector<1x256xf32>
    %187 = arith.addf %182, %186 : vector<1x256xf32>
    %188 = arith.fptosi %187 : vector<1x256xf32> to vector<1x256xi32>
    %189 = vector.broadcast %188 : vector<1x256xi32> to vector<256x256xi32>
    %190 = arith.cmpi eq, %64, %189 : vector<256x256xi32>
    %cst_58 = arith.constant 0.000000e+00 : f32
    %191 = vector.shape_cast %176 : vector<1x256xf32> to vector<1x256xf32>
    %192 = vector.broadcast %191 : vector<1x256xf32> to vector<256x256xf32>
    %193 = vector.broadcast %cst_58 : f32 to vector<256x256xf32>
    %194 = arith.select %190, %192, %193 : vector<256x256xi1>, vector<256x256xf32>
    %195 = arith.addf %162, %194 : vector<256x256xf32>
    %c0_59 = arith.constant 0 : index
    %c0_60 = arith.constant 0 : index
    %c0_61 = arith.constant 0 : index
    %196 = vector.load %arg4[%c0_59, %c0_60, %c0_61] : memref<1x4x256xf32, #tpu.memory_space<vmem>>, vector<1x4x256xf32>
    %197 = vector.shape_cast %196 : vector<1x4x256xf32> to vector<4x256xf32>
    %cst_62 = arith.constant dense<0.000000e+00> : vector<4x256xf32>
    %198 = tpu.matmul %197, %195, %cst_62 {dimension_numbers = #tpu.dot_dimension_numbers<[1], [0], [0], [1], [0, 0, 1, 1], [], []>} : vector<4x256xf32>, vector<256x256xf32>, vector<4x256xf32> -> vector<4x256xf32>
    %c0_63 = arith.constant 0 : index
    %c0_64 = arith.constant 0 : index
    %c0_65 = arith.constant 0 : index
    %199 = vector.load %arg5[%c0_63, %c0_64, %c0_65] : memref<1x4x256xf32, #tpu.memory_space<vmem>>, vector<1x4x256xf32>
    %200 = vector.shape_cast %199 : vector<1x4x256xf32> to vector<4x256xf32>
    %201 = vector.shape_cast %198 : vector<4x256xf32> to vector<1x4x256xf32>
    tpu.vector_store %arg5[%c0_63, %c0_64, %c0_65], %201 {strides = array<i32>} : memref<1x4x256xf32, #tpu.memory_space<vmem>>, vector<1x4x256xf32>,
    return
  }
  func.func @transform_0(%arg0: i32) -> (i32, i32) {
    %c0_i32 = arith.constant 0 : i32
    %c0_i32_0 = arith.constant 0 : i32
    %c0_i32_1 = arith.constant 0 : i32
    return %c0_i32, %c0_i32_0 : i32, i32
  }
  func.func @transform_1(%arg0: i32) -> (i32, i32) {
    %c0_i32 = arith.constant 0 : i32
    %c0_i32_0 = arith.constant 0 : i32
    %c0_i32_1 = arith.constant 0 : i32
    return %c0_i32, %c0_i32_0 : i32, i32
  }
  func.func @transform_2(%arg0: i32) -> (i32, i32) {
    %c0_i32 = arith.constant 0 : i32
    %c0_i32_0 = arith.constant 0 : i32
    %c0_i32_1 = arith.constant 0 : i32
    return %c0_i32, %c0_i32_0 : i32, i32
  }
  func.func @transform_3(%arg0: i32) -> (i32, i32, i32) {
    %c0_i32 = arith.constant 0 : i32
    %c0_i32_0 = arith.constant 0 : i32
    %c0_i32_1 = arith.constant 0 : i32
    return %arg0, %c0_i32, %c0_i32_0 : i32, i32, i32
  }
  func.func @transform_4(%arg0: i32) -> (i32, i32, i32) {
    %c0_i32 = arith.constant 0 : i32
    %c0_i32_0 = arith.constant 0 : i32
    %c0_i32_1 = arith.constant 0 : i32
    return %arg0, %c0_i32, %c0_i32_0 : i32, i32, i32
  }
}

</mosaic_0001>

<bundles_post_ra>
// kernel: tpu_custom_call.1
= control target key start
LH: loop header
LB: loop body
LE: loop exit
PB: predicated region body
PF: predicated region fallthrough
CT: control target
= control target key end

     0   :  { %s2699_s0 = inlined_call_operand.hbm [shape: f32[2,8], index: 0, kind: input, shape index: {}]   ;;  %s2700_s1 = inlined_call_operand.hbm [shape: f32[1,256], index: 1, kind: input, shape index: {}]   ;;  %s2701_s2 = inlined_call_operand.vmem [shape: f32[1,256], index: 2, kind: input, shape index: {}]   ;;  %s2702_s3 = inlined_call_operand.hbm [shape: f32[2,4,256], index: 3, kind: input, shape index: {}]   ;;  %s2703_s4 = inlined_call_operand.hbm [shape: f32[2,4,256], index: 4, kind: output, shape index: {}]  }
   0x1   :  { %2709 = sst [smem:[#allocation14_spill]] %s2699_s0 }
   0x2   :  { %2710 = sst [smem:[#allocation15_spill]] %s2700_s1 }
   0x3   :  { %9 = vsyncpa [#allocation5], 0 }
   0x4   :  { %10 = vsyncpa [#allocation3], 0 }
   0x5   :  { %11 = vsyncpa [#allocation8], 0 }
   0x6   :  { %13 = vsyncpa [#allocation8 + $0x1], 0 }
   0x7   :  { %14 = vsyncpa [#allocation4], 0 }
   0x8   :  { %16 = vsyncpa [#allocation4 + $0x1], 0  ;;  %s1604_s15 = smov 0   ;;  %s1606_s16 = smov 0  }
   0x9   :  { %s1608_s17 = smov 0   ;;  %s1610_s18 = smov 0  }
   0xa LB: > { %s1625_s19 = sadd.s32 4294967295, %s1573_s18   ;;  %s1337_s20 = sadd.s32 4294967294, %s1573_s18   ;;  %s1573_s18 = sphi %s1610_s18, %s2739_s18   ;;  %s1569_s17 = sphi %s1608_s17, %s2738_s17   ;;  %s1565_s16 = sphi %s1606_s16, %s2737_s16   ;;  %s1561_s15 = sphi %s1604_s15, %s2736_s15  }
   0xb   : > { %p105_p0 = scmp.ne.s32.totalorder %s1565_s16, %s1561_s15  ;;  %p2704_p1 = scmp.eq.s32.totalorder %s1625_s19, 0 }
   0xc   : > { %p129_p2 = scmp.eq.s32.totalorder %s1625_s19, 1  ;;  %p135_p3 = scmp.eq.s32.totalorder %s1337_s20, 1 }
   0xd   : > { %p1634_p4 = por %p2704_p1, %p105_p0  ;;  %p1338_p5 = scmp.ge.s32.totalorder %s1573_s18, 1 }
   0xe   : > { %p1639_p6 = por %p135_p3, %p105_p0  ;;  %p142_p7 = scmp.lt.s32.totalorder %s1573_s18, 3 }
   0xf   : > { %s2711_s21 = scalar_select %p1634_p4, 1, 0 }
  0x10   : > { %s2712_s22 = scalar_select %p1639_p6, 1, 0 }
  0x11   : > { %p1644_p8 = pnand %p1338_p5, %p142_p7  ;;  %s1575_s24 = smov [#allocation6]  }
  0x12   : > { %s164_s25 = sshll.u32 %s1575_s24, 4  ;;  %s1658_s27 = sadd.s32 1, %s1573_s18   ;;  %s165_s25 = int_to_ptr.vmem [resolvable:$true] %s164_s25 }
  0x13   : > { %s2713_s23 = scalar_select %p1644_p8, 1, 0 }
  0x14   : > { %p1380_p10 = pneg %p1644_p8  ;;  %s89_s28 = ssub.s32 %s1573_s18, %s1658_s27 }
  0x15   : > { %s92_s29 = sadd.s32 1, %s1569_s17  ;;  %p1663_p12 = scmp.eq.s32.totalorder %s89_s28, 0 }
  0x16   : > { %p1653_p11 = pnand %p1380_p10, %p2704_p1  ;;  %s1576_s5 = smov [#allocation2]  }
  0x17   : > { %s2716_s0 = sld [smem:[#allocation14_spill]]  ;;  %s1458_s8 = scalar_lea.vmem %s165_s25, 32 }
  0x18   : > { %p1449_p13 = pneg %p1653_p11  ;;  %p1459_p0 = scmp.ne.s32.totalorder %s165_s25, %s1458_s8 }
  0x19   : > { %p1466_p7 = scmp.lt.s32.totalorder %s165_s25, %s165_s25  ;;  %p1467_p10 = scmp.lt.s32.totalorder %s1458_s8, %s1458_s8 }
  0x1a   : > { %p1461_p3 = pnand %p1459_p0, %p1449_p13 }
  0x1b   : > { %p1468_p9 = por %p1467_p10, %p1466_p7 }
  0x1c   : > { %p1462_p5 = pneg %p1461_p3 }
  0x1d   : > { %1383 = dma.hbm_to_smem (!%p1653_p11), %s2716_s0, 32, %s1576_s5, [#allocation5]  }
  0x1e   : > { %p1469_p1 = pnand %p1468_p9, %p1462_p5 }
  0x20   : > { %1472 = shalt.err (!%p1469_p1)
}
  0x21   : > { %s2717_s1 = sld [smem:[#allocation15_spill]]  ;;  %p99_p9 = scmp.ne.s32.totalorder %s1569_s17, %s1565_s16 }
  0x22   : > { %s1682_s11 = scalar_select %p1663_p12, %s1569_s17, %s92_s29  }
  0x23   : > { %p100_p1 = scmp.eq.s32.totalorder %s1573_s18, 0  ;;  %p1397_p13 = scmp.lt.s32.totalorder %s1573_s18, 2 }
  0x24   : > { %s178_s12 = sand.u32 1, %s1569_s17   ;;  %p1691_p3 = por %p129_p2, %p99_p9 }
  0x25   : > { %p101_p0 = por %p100_p1, %p99_p9  ;;  %s1342_s14 = sshll.u32 %s178_s12, 3 }
  0x26   : > { %s2718_s13 = scalar_select %p1691_p3, 1, 0 }
  0x27   : > { %1386 = dma.hbm_to_vmem [thread:$0]  (!%p1653_p11), %s2717_s1, 32, %s165_s25, [#allocation3]  }
  0x28   : > { %s1358_s20 = sshll.u32 %s1573_s18, 7  ;;  %s182_s25 = scalar_lea.vmem [#allocation7], %s1342_s14 }
  0x29   : > { %s1699_s28 = scalar_lea.hbm %s2702_s3, %s1358_s20  ;;  %s190_s29 = sshll.u32 %s182_s25, 4  ;;  %s191_s29 = int_to_ptr.vmem [resolvable:$true] %s190_s29 }
  0x2a   : > { %p1701_p11 = pnand %p1397_p13, %p101_p0  ;;  %s179_s5 = scalar_lea.sflag [#allocation8], %s178_s12 }
  0x2b   : > { %s1473_s6 = scalar_lea.hbm %s1699_s28, 128  ;;  %s1478_s9 = scalar_lea.hbm %s2702_s3, 256 }
  0x2c   : > { %p1474_p2 = scmp.ne.s32.totalorder %s1699_s28, %s1473_s6  ;;  %p1475_p12 = pneg %p1701_p11 }
  0x2d   : > { %p1479_p10 = scmp.lt.s32.totalorder %s1699_s28, %s2702_s3  ;;  %p1480_p9 = scmp.lt.s32.totalorder %s1478_s9, %s1473_s6 }
  0x2e   : > { %p1476_p5 = pnand %p1475_p12, %p1474_p2 }
  0x2f   : > { %p1481_p1 = por %p1480_p9, %p1479_p10 }
  0x30   : > { %p1477_p7 = pneg %p1476_p5 }
  0x32   : > { %p1482_p13 = pnand %p1481_p1, %p1477_p7 }
  0x34   : > { %1485 = shalt.err (!%p1482_p13)
}
  0x35   : > { %s1486_s20 = scalar_lea.vmem %s191_s29, 128  ;;  %s1577_s12 = smov [#allocation7]  }
  0x36   : > { %p1487_p0 = scmp.ne.s32.totalorder %s191_s29, %s1486_s20  ;;  %s1491_s24 = sshll.u32 %s1577_s12, 4  ;;  %s1492_s24 = int_to_ptr.vmem [resolvable:$false] %s1491_s24 }
  0x37   : > { %s1493_s26 = scalar_lea.vmem %s1492_s24, 256  ;;  %p1494_p2 = scmp.lt.s32.totalorder %s191_s29, %s1492_s24 }
  0x38   : > { %p1489_p6 = pnand %p1487_p0, %p1475_p12  ;;  %p1495_p5 = scmp.lt.s32.totalorder %s1493_s26, %s1486_s20 }
  0x3a   : > { %p1490_p3 = pneg %p1489_p6  ;;  %p1496_p4 = por %p1495_p5, %p1494_p2 }
  0x3c   : > { %p1497_p8 = pnand %p1496_p4, %p1490_p3 }
  0x3e   : > { %1500 = shalt.err (!%p1497_p8)
}
  0x3f   : > { %1390 = dma.hbm_to_vmem [thread:$0]  (!%p1701_p11), %s1699_s28, 128, %s191_s29, %s179_s5  }
  0x40   : > { %p2720_p7 = scmp.ne.s32.totalorder %s2713_s23, 0 }
  0x41   : > { %p2721_p10 = scmp.eq.s32.totalorder (!%p2720_p7), %s1625_s19, 0 }
  0x42   : > { %199 = sbr.rel (%p2720_p7) target bundleno = 520 (0x208), region = 36 }
  0x47   : > { %1544 = dma.done.wait (%p2721_p10), [#allocation5], 32   ;;  %p2722_p6 = pmov %p2721_p10 }
  0x49   : > { %1546 = vsyncadd (%p2722_p6), [#allocation5], 4294967264  ;;  %p2723_p12 = pmov %p2722_p6 }
  0x4a   : > { %p2724_p9 = pmov %p2722_p6 }
  0x4b   : > { %1548 = dma.done.wait (%p2723_p12), [#allocation3], 32  }
  0x4c   : > { %1550 = vsyncadd (%p2724_p9), [#allocation3], 4294967264  ;;  %s1730_s25 = sand.u32 1, %s1565_s16   ;;  %p2725_p4 = scmp.ne.s32.totalorder %s2711_s21, 0 }
  0x4d   : > { %s2708_s23 = sshll.u32 %s1730_s25, 3  ;;  %s210_s28 = scalar_lea.sflag [#allocation8], %s1730_s25 }
  0x4e   : > { %s1736_s29 = scalar_lea.vmem [#allocation7], %s2708_s23 }
  0x4f   : > { %1552 = dma.done.wait (%p2725_p4), %s210_s28, 128  }
  0x50   : > { %1554 = vsyncadd (%p2725_p4), %s210_s28, 4294967168 }
  0x51   : > { %218 = sfence }
  0x52   : > { %s1743_s30 = sshll.u32 %s1625_s19, 7  ;;  %v255_v0 = vld [vmem:[#allocation6] sm:$0x3]  ;;  %v291_v19 = vlaneseq  ;;  %p2733_p3 = scmp.ne.s32.totalorder %s2718_s13, 0 }
  0x53   : > { %s240_s5 = sld [smem:[#allocation2 + %s1743_s30]]  ;;  %s241_s6 = sadd.s32 1, %s1743_s30  ;;  %v256_v1 = vld [vmem:[%s2701_s2] sm:$0x3] }
  0x54   : > { %s242_s7 = sld [smem:[#allocation2 + %s241_s6]]  ;;  %s243_s8 = sadd.s32 2, %s1743_s30  ;;  %v1756_v24 = vshrl.u32 %v291_v19, 7 }
  0x55   : > { %s244_s9 = sld [smem:[#allocation2 + %s243_s8]]  ;;  %s245_s10 = sadd.s32 3, %s1743_s30 }
  0x56   : > { %s246_s21 = sld [smem:[#allocation2 + %s245_s10]]  ;;  %s247_s14 = sadd.s32 4, %s1743_s30  ;;  %v1759_v28 = vadd.s32 120, %v1756_v24  ;;  %v1762_v30 = vsub.s32 1, %v1756_v24  ;;  %v1765_v31 = vsub.s32 0, %v1756_v24  ;;  %v1768_v32 = vadd.s32 112, %v1756_v24 }
  0x57   : > { %s248_s20 = sld [smem:[#allocation2 + %s247_s14]]  ;;  %s249_s12 = sadd.s32 5, %s1743_s30  ;;  %v1771_v34 = vadd.s32 104, %v1756_v24  ;;  %v1774_v35 = vadd.s32 96, %v1756_v24  ;;  %v1777_v36 = vadd.s32 88, %v1756_v24  ;;  %v1780_v38 = vadd.s32 80, %v1756_v24 }
  0x58   : > { %s250_s19 = sld [smem:[#allocation2 + %s249_s12]]  ;;  %s251_s24 = sadd.s32 6, %s1743_s30  ;;  %v1783_v39 = vadd.s32 72, %v1756_v24  ;;  %v1786_v40 = vadd.s32 64, %v1756_v24  ;;  %v1793_v46 = vadd.s32 56, %v1756_v24  ;;  %v1796_v47 = vadd.s32 48, %v1756_v24 }
  0x59   : > { %s252_s23 = sld [smem:[#allocation2 + %s251_s24]]  ;;  %s253_s0 = sadd.s32 7, %s1743_s30  ;;  %v257_v2 = vstv %s240_s5  ;;  %v1805_v54 = vadd.s32 40, %v1756_v24  ;;  %v1808_v55 = vadd.s32 32, %v1756_v24  ;;  %v1811_v56 = vadd.s32 24, %v1756_v24 }
  0x5a   : > { %s254_s1 = sld [smem:[#allocation2 + %s253_s0]]  ;;  %v258_v3 = vmul.f32 %v257_v2, %v255_v0  ;;  %v259_v4 = vstv %s242_s7  ;;  %v1819_v60 = vadd.s32 16, %v1756_v24  ;;  %v1856_v19 = vadd.s32 200, %v1756_v24  ;;  %s2732_s0 = sshll.u32 %s1730_s25, 3 }
  0x5b   : > { %v260_v5 = vmul.f32 %v259_v4, %v256_v1  ;;  %v262_v6 = vstv %s244_s9  ;;  %s1241_s6 = scalar_lea.hbm %s2703_s4, %s1743_s30  ;;  %s1229_s7 = scalar_lea.sflag [#allocation4], %s1730_s25 }
  0x5c   : > { %v266_v7 = vstv %s246_s21  ;;  %s1578_s9 = smov [#allocation9]  }
  0x5d   : > { %v261_v8 = vadd.f32 %v260_v5, %v258_v3  ;;  %v267_v9 = vmul.f32 %v266_v7, %v255_v0  ;;  %v268_v10 = vstv %s248_s20  ;;  %v1825_v3 = vadd.s32 8, %v1756_v24  ;;  %s1505_s10 = sshll.u32 %s1578_s9, 4  ;;  %s1506_s10 = int_to_ptr.vmem [resolvable:$false] %s1505_s10 }
  0x5e   : > { %v269_v11 = vmul.f32 %v268_v10, %v256_v1  ;;  %v271_v14 = vstv %s250_s19  ;;  %v1831_v7 = vadd.s32 248, %v1756_v24  ;;  %v1840_v10 = vadd.s32 232, %v1756_v24  ;;  %s1507_s21 = scalar_lea.vmem %s1506_s10, 256 }
  0x5f   : > { %v263_v12 = vadd.f32 %v262_v6, %v261_v8  ;;  %v264_v13 = vstv %s252_s23 }
  0x60   : > { %v270_v15 = vadd.f32 %v269_v11, %v267_v9  ;;  %v273_v17 = vstv %s254_s1  ;;  %v1837_v9 = vadd.s32 240, %v1756_v24  ;;  %v1843_v11 = vadd.s32 224, %v1756_v24  ;;  %s238_s1 = scalar_lea.vmem [#allocation9], %s2732_s0 }
  0x61   : > { %v265_v16 = vmul.f32 %v264_v13, %v263_v12  ;;  %s1243_s23 = sshll.u32 %s238_s1, 4  ;;  %s1244_s23 = int_to_ptr.vmem [resolvable:$true] %s1243_s23 }
  0x62   : > { %v272_v18 = vadd.f32 %v271_v14, %v270_v15  ;;  %v1849_v15 = vadd.s32 216, %v1756_v24  ;;  %s1501_s8 = scalar_lea.vmem %s1244_s23, 128  ;;  %p1508_p13 = scmp.lt.s32.totalorder %s1244_s23, %s1506_s10 }
  0x63   : > { %v275_v20 = vadd.f32 1.0, %v265_v16  ;;  %p1502_p8 = scmp.ne.s32.totalorder %s1244_s23, %s1501_s8  ;;  %p1509_p0 = scmp.lt.s32.totalorder %s1507_s21, %s1501_s8 }
  0x64   : > { %v274_v21 = vmul.f32 %v273_v17, %v272_v18  ;;  %v1853_v18 = vadd.s32 208, %v1756_v24 }
  0x65   : > { %v276_v22 = vmul.f32 16.0, %v275_v20  ;;  %p1503_p11 = pnand %p1502_p8, %p2733_p3  ;;  %p1510_p2 = por %p1509_p0, %p1508_p13 }
  0x66   : > { %v279_v23 = vadd.f32 1.0, %v274_v21 }
  0x67   : > { %v1351_v25 = vadd.f32 -1.0, %v276_v22  ;;  %p1504_p1 = pneg %p1503_p11 }
  0x68   : > { %v280_v26 = vmul.f32 16.0, %v279_v23 }
  0x69   : > { %v278_v27 = vmul.f32 0.5, %v1351_v25  ;;  %p1511_p5 = pnand %p1510_p2, %p1504_p1 }
  0x6a   : > { %v1352_v29 = vadd.f32 -1.0, %v280_v26 }
  0x6b   : > { %v283_v33 = vfloor.f32 %v278_v27 }
  0x6c   : > { %v282_v37 = vmul.f32 0.5, %v1352_v29 }
  0x6d   : > { %v285_v41 = vadd.f32 1.0, %v283_v33  ;;  %v287_v42 = vsub.f32 %v278_v27, %v283_v33  ;;  %vm325_vm0 = vcmp.ge.f32.partialorder %v283_v33, 0.0  ;;  %vm326_vm1 = vcmp.le.f32.partialorder %v283_v33, 15.0 }
  0x6e   : > { %v284_v43 = vfloor.f32 %v282_v37  ;;  %vm1788_vm2 = vmand %vm325_vm0, %vm326_vm1  ;;  %v336_v45 = vmax.f32 %v283_v33, 0.0 }
  0x6f   : > { %v288_v48 = vsub.f32 1.0, %v287_v42  ;;  %vm488_vm3 = vcmp.ge.f32.partialorder %v285_v41, 0.0  ;;  %vm489_vm4 = vcmp.le.f32.partialorder %v285_v41, 15.0  ;;  %v494_v49 = vmax.f32 %v285_v41, 0.0 }
  0x70   : > { %v286_v50 = vadd.f32 1.0, %v284_v43  ;;  %v289_v51 = vsub.f32 %v282_v37, %v284_v43  ;;  %vm328_vm5 = vcmp.ge.f32.partialorder %v284_v43, 0.0  ;;  %vm330_vm6 = vcmp.le.f32.partialorder %v284_v43, 15.0  ;;  %vm1798_vm7 = vmand %vm488_vm3, %vm489_vm4 }
  0x71   : > { %vm329_vm8 = vmand %vm1788_vm2, %vm328_vm5  ;;  %v333_v53 = vmax.f32 %v284_v43, 0.0  ;;  %v337_v59 = vmin.f32 %v336_v45, 15.0  ;;  %v495_v62 = vmin.f32 %v494_v49, 15.0 }
  0x72   : > { %v290_v57 = vsub.f32 1.0, %v289_v51  ;;  %vm1814_vm9 = vmand %vm329_vm8, %vm330_vm6  ;;  %vm710_vm10 = vcmp.ge.f32.partialorder %v286_v50, 0.0  ;;  %vm712_vm12 = vcmp.le.f32.partialorder %v286_v50, 15.0  ;;  %v715_v63 = vmax.f32 %v286_v50, 0.0 }
  0x73   : > { %v334_v61 = vmin.f32 %v333_v53, 15.0  ;;  %vm491_vm11 = vmand %vm1798_vm7, %vm328_vm5  ;;  %v709_v2 = vmul.f32 %v289_v51, %v288_v48  ;;  %v931_v6 = vmul.f32 %v289_v51, %v287_v42 }
  0x74   : > { %v324_v0 = vmul.f32 %v290_v57, %v288_v48  ;;  %v487_v1 = vmul.f32 %v290_v57, %v287_v42  ;;  %vm492_vm13 = vmand %vm491_vm11, %vm330_vm6  ;;  %v716_v5 = vmin.f32 %v715_v63, 15.0 }
  0x75   : > { %v335_v4 = vmul.f32 16.0, %v334_v61  ;;  %vm711_vm14 = vmand %vm1788_vm2, %vm710_vm10 }
  0x76   : > { %v332_v8 = vsel %vm1814_vm9, %v324_v0, 0.0  ;;  %vm713_vm15 = vmand %vm711_vm14, %vm712_vm12  ;;  %v493_v13 = vsel %vm492_vm13, %v487_v1, 0.0  ;;  %v717_v17 = vmul.f32 16.0, %v716_v5 }
  0x77   : > { %v338_v12 = vadd.f32 %v337_v59, %v335_v4  ;;  %v496_v14 = vadd.f32 %v495_v62, %v335_v4  ;;  %vm932_vm0 = vmand %vm1798_vm7, %vm710_vm10  ;;  %v714_v16 = vsel %vm713_vm15, %v709_v2, 0.0  ;;  %v1859_v21 = vrot.slane %v332_v8, %v1762_v30 }
  0x78   : > { %vm933_vm1 = vmand %vm932_vm0, %vm712_vm12  ;;  %v1862_v25 = vrot.slane %v493_v13, %v1762_v30  ;;  %v718_v26 = vadd.f32 %v717_v17, %v337_v59  ;;  %v935_v27 = vadd.f32 %v717_v17, %v495_v62  ;;  %v1865_v29 = vrot.slane %v332_v8, %v1765_v31 }
  0x79   : > { %v1360_v20 = vtrunc.f32 %v338_v12  ;;  %v1362_v22 = vtrunc.f32 %v496_v14  ;;  %v934_v23 = vsel %vm933_vm1, %v931_v6, 0.0  ;;  %v1868_v41 = vrot.slane %v714_v16, %v1762_v30 }
  0x7a   : > { %v1871_v42 = vrot.slane %v493_v13, %v1765_v31  ;;  %v1364_v43 = vtrunc.f32 %v718_v26  ;;  %v1366_v44 = vtrunc.f32 %v935_v27  ;;  %v1874_v45 = vrot.slane %v934_v23, %v1762_v30 }
  0x7b   : > { %v1361_v33 = vcvt.f32.s32 %v1360_v20  ;;  %v1363_v37 = vcvt.f32.s32 %v1362_v22  ;;  %v1877_v48 = vrot.slane %v714_v16, %v1765_v31  ;;  %v1892_v58 = vrot.slane %v934_v23, %v1765_v31 }
  0x7c   : > { %v1365_v53 = vcvt.f32.s32 %v1364_v43  ;;  %v1367_v57 = vcvt.f32.s32 %v1366_v44  ;;  %v1895_v59 = vadd.s32 192, %v1756_v24 }
  0x7d   : > { %v1880_v49 = vrot.slane %v1361_v33, %v1762_v30  ;;  %v1883_v50 = vrot.slane %v1363_v37, %v1762_v30  ;;  %v1886_v51 = vrot.slane %v1361_v33, %v1765_v31  ;;  %v1889_v52 = vrot.slane %v1363_v37, %v1765_v31 }
  0x7e   : > { %v1908_v63 = vrot.slane %v1365_v53, %v1762_v30  ;;  %v1911_v0 = vrot.slane %v1367_v57, %v1762_v30  ;;  %v1916_v5 = vrot.slane %v1365_v53, %v1765_v31  ;;  %v1923_v8 = vrot.slane %v1367_v57, %v1765_v31 }
  0x7f   : > { %vm379_vm2 = vcmp.eq.s32.totalorder %v1759_v28, %v1880_v49  ;;  %vm537_vm3 = vcmp.eq.s32.totalorder %v1759_v28, %v1883_v50  ;;  %vm378_vm4 = vcmp.eq.s32.totalorder %v1759_v28, %v1886_v51  ;;  %vm536_vm5 = vcmp.eq.s32.totalorder %v1759_v28, %v1889_v52 }
  0x80   : > { %v454_v61 = vsel %vm379_vm2, %v1859_v21, 0.0  ;;  %v612_v62 = vsel %vm537_vm3, %v1862_v25, 0.0  ;;  %v453_v2 = vsel %vm378_vm4, %v1865_v29, 0.0  ;;  %v611_v4 = vsel %vm536_vm5, %v1871_v42, 0.0 }
  0x81   : > { %v676_v1 = vadd.f32 %v612_v62, %v454_v61  ;;  %vm759_vm6 = vcmp.eq.s32.totalorder %v1759_v28, %v1908_v63  ;;  %vm976_vm7 = vcmp.eq.s32.totalorder %v1759_v28, %v1911_v0  ;;  %v675_v6 = vadd.f32 %v611_v4, %v453_v2 }
  0x82   : > { %v834_v30 = vsel %vm759_vm6, %v1868_v41, 0.0  ;;  %v1051_v12 = vsel %vm976_vm7, %v1874_v45, 0.0  ;;  %vm758_vm8 = vcmp.eq.s32.totalorder %v1759_v28, %v1916_v5  ;;  %vm377_vm9 = vcmp.eq.s32.totalorder %v1768_v32, %v1880_v49 }
  0x83   : > { %v898_v13 = vadd.f32 %v834_v30, %v676_v1  ;;  %v833_v14 = vsel %vm758_vm8, %v1877_v48, 0.0  ;;  %vm975_vm10 = vcmp.eq.s32.totalorder %v1759_v28, %v1923_v8  ;;  %v452_v16 = vsel %vm377_vm9, %v1859_v21, 0.0 }
  0x84   : > { %v897_v31 = vadd.f32 %v833_v14, %v675_v6  ;;  %v1050_v17 = vsel %vm975_vm10, %v1892_v58, 0.0  ;;  %vm535_vm11 = vcmp.eq.s32.totalorder %v1768_v32, %v1883_v50  ;;  %vm757_vm12 = vcmp.eq.s32.totalorder %v1768_v32, %v1908_v63 }
  0x85   : > { %v1115_v20 = vadd.f32 %v1051_v12, %v898_v13  ;;  %v610_v22 = vsel %vm535_vm11, %v1862_v25, 0.0  ;;  %v832_v23 = vsel %vm757_vm12, %v1868_v41, 0.0  ;;  %vm974_vm13 = vcmp.eq.s32.totalorder %v1768_v32, %v1911_v0 }
  0x86   : > { %v1114_v28 = vadd.f32 %v1050_v17, %v897_v31  ;;  %v674_v26 = vadd.f32 %v610_v22, %v452_v16  ;;  %v1049_v27 = vsel %vm974_vm13, %v1874_v45, 0.0  ;;  %vm376_vm14 = vcmp.eq.s32.totalorder %v1768_v32, %v1886_v51 }
  0x87   : > { %1152 = vmatprep.subr.mxu0 %v1115_v20  ;;  %v451_v33 = vsel %vm376_vm14, %v1865_v29, 0.0  ;;  %vm534_vm15 = vcmp.eq.s32.totalorder %v1768_v32, %v1889_v52  ;;  %vm756_vm0 = vcmp.eq.s32.totalorder %v1768_v32, %v1916_v5  ;;  %vm973_vm1 = vcmp.eq.s32.totalorder %v1768_v32, %v1923_v8 }
  0x88   : > { %1153 = vmatpush1.msra.mxu0 %v1114_v28  ;;  %v896_v37 = vadd.f32 %v832_v23, %v674_v26  ;;  %v609_v43 = vsel %vm534_vm15, %v1871_v42, 0.0  ;;  %v831_v44 = vsel %vm756_vm0, %v1877_v48, 0.0  ;;  %v1048_v53 = vsel %vm973_vm1, %v1892_v58, 0.0 }
  0x89   : > { %v673_v57 = vadd.f32 %v609_v43, %v451_v33  ;;  %vm375_vm2 = vcmp.eq.s32.totalorder %v1771_v34, %v1880_v49  ;;  %vm533_vm3 = vcmp.eq.s32.totalorder %v1771_v34, %v1883_v50  ;;  %vm755_vm4 = vcmp.eq.s32.totalorder %v1771_v34, %v1908_v63 }
  0x8a   : > { %v1113_v61 = vadd.f32 %v1049_v27, %v896_v37  ;;  %v450_v32 = vsel %vm375_vm2, %v1859_v21, 0.0  ;;  %v608_v62 = vsel %vm533_vm3, %v1862_v25, 0.0  ;;  %v830_v1 = vsel %vm755_vm4, %v1868_v41, 0.0 }
  0x8b   : > { %v895_v2 = vadd.f32 %v831_v44, %v673_v57  ;;  %v672_v4 = vadd.f32 %v608_v62, %v450_v32  ;;  %vm972_vm5 = vcmp.eq.s32.totalorder %v1771_v34, %v1911_v0  ;;  %vm374_vm6 = vcmp.eq.s32.totalorder %v1771_v34, %v1886_v51 }
  0x8c   : > { %1154 = vmatprep.subr.mxu0 %v1113_v61  ;;  %v1047_v6 = vsel %vm972_vm5, %v1874_v45, 0.0  ;;  %v449_v30 = vsel %vm374_vm6, %v1865_v29, 0.0  ;;  %vm532_vm7 = vcmp.eq.s32.totalorder %v1771_v34, %v1889_v52  ;;  %vm754_vm8 = vcmp.eq.s32.totalorder %v1771_v34, %v1916_v5 }
  0x8d   : > { %v1112_v12 = vadd.f32 %v1048_v53, %v895_v2  ;;  %v894_v13 = vadd.f32 %v830_v1, %v672_v4  ;;  %v607_v14 = vsel %vm532_vm7, %v1871_v42, 0.0  ;;  %v829_v16 = vsel %vm754_vm8, %v1877_v48, 0.0 }
  0x8e   : > { %v671_v31 = vadd.f32 %v607_v14, %v449_v30  ;;  %vm971_vm9 = vcmp.eq.s32.totalorder %v1771_v34, %v1923_v8  ;;  %vm373_vm10 = vcmp.eq.s32.totalorder %v1774_v35, %v1880_v49  ;;  %vm531_vm11 = vcmp.eq.s32.totalorder %v1774_v35, %v1883_v50 }
  0x8f   : > { %1155 = vmatpush1.msra.mxu0 %v1112_v12  ;;  %v1111_v17 = vadd.f32 %v1047_v6, %v894_v13  ;;  %v1046_v20 = vsel %vm971_vm9, %v1892_v58, 0.0  ;;  %v448_v22 = vsel %vm373_vm10, %v1859_v21, 0.0  ;;  %v606_v23 = vsel %vm531_vm11, %v1862_v25, 0.0 }
  0x90   : > { %v893_v28 = vadd.f32 %v829_v16, %v671_v31  ;;  %v670_v26 = vadd.f32 %v606_v23, %v448_v22  ;;  %vm753_vm12 = vcmp.eq.s32.totalorder %v1774_v35, %v1908_v63  ;;  %vm970_vm13 = vcmp.eq.s32.totalorder %v1774_v35, %v1911_v0 }
  0x91   : > { %1156 = vmatprep.subr.mxu0 %v1111_v17  ;;  %v828_v34 = vsel %vm753_vm12, %v1868_v41, 0.0  ;;  %v1045_v27 = vsel %vm970_vm13, %v1874_v45, 0.0  ;;  %vm372_vm14 = vcmp.eq.s32.totalorder %v1774_v35, %v1886_v51  ;;  %vm530_vm15 = vcmp.eq.s32.totalorder %v1774_v35, %v1889_v52 }
  0x92   : > { %v1110_v33 = vadd.f32 %v1046_v20, %v893_v28  ;;  %v892_v37 = vadd.f32 %v828_v34, %v670_v26  ;;  %v447_v43 = vsel %vm372_vm14, %v1865_v29, 0.0  ;;  %v605_v44 = vsel %vm530_vm15, %v1871_v42, 0.0 }
  0x93   : > { %v669_v53 = vadd.f32 %v605_v44, %v447_v43  ;;  %vm752_vm0 = vcmp.eq.s32.totalorder %v1774_v35, %v1916_v5  ;;  %vm969_vm1 = vcmp.eq.s32.totalorder %v1774_v35, %v1923_v8  ;;  %vm371_vm2 = vcmp.eq.s32.totalorder %v1777_v36, %v1880_v49 }
  0x94   : > { %1157 = vmatpush1.msra.mxu0 %v1110_v33  ;;  %v1109_v57 = vadd.f32 %v1045_v27, %v892_v37  ;;  %v827_v61 = vsel %vm752_vm0, %v1877_v48, 0.0  ;;  %v1044_v32 = vsel %vm969_vm1, %v1892_v58, 0.0  ;;  %v446_v62 = vsel %vm371_vm2, %v1859_v21, 0.0 }
  0x95   : > { %v891_v1 = vadd.f32 %v827_v61, %v669_v53  ;;  %vm529_vm3 = vcmp.eq.s32.totalorder %v1777_v36, %v1883_v50  ;;  %vm751_vm4 = vcmp.eq.s32.totalorder %v1777_v36, %v1908_v63  ;;  %vm968_vm5 = vcmp.eq.s32.totalorder %v1777_v36, %v1911_v0 }
  0x96   : > { %1158 = vmatprep.subr.mxu0 %v1109_v57  ;;  %v604_v35 = vsel %vm529_vm3, %v1862_v25, 0.0  ;;  %v826_v2 = vsel %vm751_vm4, %v1868_v41, 0.0  ;;  %v1043_v4 = vsel %vm968_vm5, %v1874_v45, 0.0  ;;  %vm370_vm6 = vcmp.eq.s32.totalorder %v1777_v36, %v1886_v51 }
  0x97   : > { %v1108_v6 = vadd.f32 %v1044_v32, %v891_v1  ;;  %v668_v30 = vadd.f32 %v604_v35, %v446_v62  ;;  %v445_v12 = vsel %vm370_vm6, %v1865_v29, 0.0  ;;  %vm528_vm7 = vcmp.eq.s32.totalorder %v1777_v36, %v1889_v52 }
  0x98   : > { %v603_v13 = vsel %vm528_vm7, %v1871_v42, 0.0  ;;  %vm750_vm8 = vcmp.eq.s32.totalorder %v1777_v36, %v1916_v5  ;;  %vm967_vm9 = vcmp.eq.s32.totalorder %v1777_v36, %v1923_v8  ;;  %vm369_vm10 = vcmp.eq.s32.totalorder %v1780_v38, %v1880_v49 }
  0x99   : > { %1159 = vmatpush1.msra.mxu0 %v1108_v6  ;;  %v890_v14 = vadd.f32 %v826_v2, %v668_v30  ;;  %v667_v16 = vadd.f32 %v603_v13, %v445_v12  ;;  %v825_v31 = vsel %vm750_vm8, %v1877_v48, 0.0  ;;  %v1042_v17 = vsel %vm967_vm9, %v1892_v58, 0.0 }
  0x9a   : > { %v444_v20 = vsel %vm369_vm10, %v1859_v21, 0.0  ;;  %vm527_vm11 = vcmp.eq.s32.totalorder %v1780_v38, %v1883_v50  ;;  %vm749_vm12 = vcmp.eq.s32.totalorder %v1780_v38, %v1908_v63  ;;  %vm966_vm13 = vcmp.eq.s32.totalorder %v1780_v38, %v1911_v0 }
  0x9b   : > { %v1107_v36 = vadd.f32 %v1043_v4, %v890_v14  ;;  %v889_v22 = vadd.f32 %v825_v31, %v667_v16  ;;  %v602_v23 = vsel %vm527_vm11, %v1862_v25, 0.0  ;;  %v824_v28 = vsel %vm749_vm12, %v1868_v41, 0.0 }
  0x9c   : > { %v666_v26 = vadd.f32 %v602_v23, %v444_v20  ;;  %v1041_v34 = vsel %vm966_vm13, %v1874_v45, 0.0  ;;  %vm368_vm14 = vcmp.eq.s32.totalorder %v1780_v38, %v1886_v51  ;;  %vm526_vm15 = vcmp.eq.s32.totalorder %v1780_v38, %v1889_v52 }
  0x9d   : > { %1160 = vmatprep.subr.mxu0 %v1107_v36  ;;  %v1106_v27 = vadd.f32 %v1042_v17, %v889_v22  ;;  %v443_v33 = vsel %vm368_vm14, %v1865_v29, 0.0  ;;  %v601_v37 = vsel %vm526_vm15, %v1871_v42, 0.0  ;;  %vm748_vm0 = vcmp.eq.s32.totalorder %v1780_v38, %v1916_v5 }
  0x9e   : > { %v888_v43 = vadd.f32 %v824_v28, %v666_v26  ;;  %v665_v44 = vadd.f32 %v601_v37, %v443_v33  ;;  %v823_v53 = vsel %vm748_vm0, %v1877_v48, 0.0  ;;  %vm965_vm1 = vcmp.eq.s32.totalorder %v1780_v38, %v1923_v8 }
  0x9f   : > { %1161 = vmatpush1.msra.mxu0 %v1106_v27  ;;  %v1040_v57 = vsel %vm965_vm1, %v1892_v58, 0.0  ;;  %vm367_vm2 = vcmp.eq.s32.totalorder %v1783_v39, %v1880_v49  ;;  %vm525_vm3 = vcmp.eq.s32.totalorder %v1783_v39, %v1883_v50  ;;  %vm747_vm4 = vcmp.eq.s32.totalorder %v1783_v39, %v1908_v63 }
  0xa0   : > { %v1105_v61 = vadd.f32 %v1041_v34, %v888_v43  ;;  %v887_v32 = vadd.f32 %v823_v53, %v665_v44  ;;  %v442_v62 = vsel %vm367_vm2, %v1859_v21, 0.0  ;;  %v600_v1 = vsel %vm525_vm3, %v1862_v25, 0.0 }
  0xa1   : > { %v664_v35 = vadd.f32 %v600_v1, %v442_v62  ;;  %v822_v38 = vsel %vm747_vm4, %v1868_v41, 0.0  ;;  %vm964_vm5 = vcmp.eq.s32.totalorder %v1783_v39, %v1911_v0  ;;  %vm366_vm6 = vcmp.eq.s32.totalorder %v1783_v39, %v1886_v51 }
  0xa2   : > { %1162 = vmatprep.subr.mxu0 %v1105_v61  ;;  %v1104_v2 = vadd.f32 %v1040_v57, %v887_v32  ;;  %v1039_v4 = vsel %vm964_vm5, %v1874_v45, 0.0  ;;  %v441_v6 = vsel %vm366_vm6, %v1865_v29, 0.0  ;;  %vm524_vm7 = vcmp.eq.s32.totalorder %v1783_v39, %v1889_v52 }
  0xa3   : > { %v886_v30 = vadd.f32 %v822_v38, %v664_v35  ;;  %v599_v12 = vsel %vm524_vm7, %v1871_v42, 0.0  ;;  %vm746_vm8 = vcmp.eq.s32.totalorder %v1783_v39, %v1916_v5  ;;  %vm963_vm9 = vcmp.eq.s32.totalorder %v1783_v39, %v1923_v8 }
  0xa4   : > { %1163 = vmatpush1.msra.mxu0 %v1104_v2  ;;  %v663_v13 = vadd.f32 %v599_v12, %v441_v6  ;;  %v821_v14 = vsel %vm746_vm8, %v1877_v48, 0.0  ;;  %v1038_v16 = vsel %vm963_vm9, %v1892_v58, 0.0  ;;  %vm365_vm10 = vcmp.eq.s32.totalorder %v1786_v40, %v1880_v49 }
  0xa5   : > { %v1103_v31 = vadd.f32 %v1039_v4, %v886_v30  ;;  %v440_v17 = vsel %vm365_vm10, %v1859_v21, 0.0  ;;  %vm523_vm11 = vcmp.eq.s32.totalorder %v1786_v40, %v1883_v50  ;;  %vm745_vm12 = vcmp.eq.s32.totalorder %v1786_v40, %v1908_v63 }
  0xa6   : > { %v885_v20 = vadd.f32 %v821_v14, %v663_v13  ;;  %v598_v39 = vsel %vm523_vm11, %v1862_v25, 0.0  ;;  %v820_v36 = vsel %vm745_vm12, %v1868_v41, 0.0  ;;  %vm962_vm13 = vcmp.eq.s32.totalorder %v1786_v40, %v1911_v0 }
  0xa7   : > { %1164 = vmatprep.subr.mxu0 %v1103_v31  ;;  %v662_v22 = vadd.f32 %v598_v39, %v440_v17  ;;  %v1037_v23 = vsel %vm962_vm13, %v1874_v45, 0.0  ;;  %vm364_vm14 = vcmp.eq.s32.totalorder %v1786_v40, %v1886_v51  ;;  %vm522_vm15 = vcmp.eq.s32.totalorder %v1786_v40, %v1889_v52 }
  0xa8   : > { %v1102_v28 = vadd.f32 %v1038_v16, %v885_v20  ;;  %v439_v26 = vsel %vm364_vm14, %v1865_v29, 0.0  ;;  %v597_v34 = vsel %vm522_vm15, %v1871_v42, 0.0  ;;  %vm744_vm0 = vcmp.eq.s32.totalorder %v1786_v40, %v1916_v5 }
  0xa9   : > { %v884_v27 = vadd.f32 %v820_v36, %v662_v22  ;;  %v661_v33 = vadd.f32 %v597_v34, %v439_v26  ;;  %v819_v37 = vsel %vm744_vm0, %v1877_v48, 0.0  ;;  %vm961_vm1 = vcmp.eq.s32.totalorder %v1786_v40, %v1923_v8 }
  0xaa   : > { %1165 = vmatpush1.msra.mxu0 %v1102_v28  ;;  %v1036_v43 = vsel %vm961_vm1, %v1892_v58, 0.0  ;;  %vm363_vm2 = vcmp.eq.s32.totalorder %v1793_v46, %v1880_v49  ;;  %vm521_vm3 = vcmp.eq.s32.totalorder %v1793_v46, %v1883_v50  ;;  %vm743_vm4 = vcmp.eq.s32.totalorder %v1793_v46, %v1908_v63 }
  0xab   : > { %v1101_v44 = vadd.f32 %v1037_v23, %v884_v27  ;;  %v883_v53 = vadd.f32 %v819_v37, %v661_v33  ;;  %v438_v57 = vsel %vm363_vm2, %v1859_v21, 0.0  ;;  %v596_v61 = vsel %vm521_vm3, %v1862_v25, 0.0 }
  0xac   : > { %v660_v32 = vadd.f32 %v596_v61, %v438_v57  ;;  %v818_v40 = vsel %vm743_vm4, %v1868_v41, 0.0  ;;  %vm960_vm5 = vcmp.eq.s32.totalorder %v1793_v46, %v1911_v0  ;;  %vm362_vm6 = vcmp.eq.s32.totalorder %v1793_v46, %v1886_v51 }
  0xad   : > { %1166 = vmatprep.subr.mxu0 %v1101_v44  ;;  %v1100_v62 = vadd.f32 %v1036_v43, %v883_v53  ;;  %v1035_v1 = vsel %vm960_vm5, %v1874_v45, 0.0  ;;  %v437_v35 = vsel %vm362_vm6, %v1865_v29, 0.0  ;;  %vm520_vm7 = vcmp.eq.s32.totalorder %v1793_v46, %v1889_v52 }
  0xae   : > { %v882_v38 = vadd.f32 %v818_v40, %v660_v32  ;;  %v595_v2 = vsel %vm520_vm7, %v1871_v42, 0.0  ;;  %vm742_vm8 = vcmp.eq.s32.totalorder %v1793_v46, %v1916_v5  ;;  %vm959_vm9 = vcmp.eq.s32.totalorder %v1793_v46, %v1923_v8 }
  0xaf   : > { %1167 = vmatpush1.msra.mxu0 %v1100_v62  ;;  %v659_v4 = vadd.f32 %v595_v2, %v437_v35  ;;  %v817_v6 = vsel %vm742_vm8, %v1877_v48, 0.0  ;;  %v1034_v30 = vsel %vm959_vm9, %v1892_v58, 0.0  ;;  %vm361_vm10 = vcmp.eq.s32.totalorder %v1796_v47, %v1880_v49 }
  0xb0   : > { %v1099_v12 = vadd.f32 %v1035_v1, %v882_v38  ;;  %v436_v13 = vsel %vm361_vm10, %v1859_v21, 0.0  ;;  %vm519_vm11 = vcmp.eq.s32.totalorder %v1796_v47, %v1883_v50  ;;  %vm741_vm12 = vcmp.eq.s32.totalorder %v1796_v47, %v1908_v63 }
  0xb1   : > { %v881_v14 = vadd.f32 %v817_v6, %v659_v4  ;;  %v594_v46 = vsel %vm519_vm11, %v1862_v25, 0.0  ;;  %v816_v16 = vsel %vm741_vm12, %v1868_v41, 0.0  ;;  %vm958_vm13 = vcmp.eq.s32.totalorder %v1796_v47, %v1911_v0 }
  0xb2   : > { %1168 = vmatprep.subr.mxu0 %v1099_v12  ;;  %v658_v31 = vadd.f32 %v594_v46, %v436_v13  ;;  %v1033_v17 = vsel %vm958_vm13, %v1874_v45, 0.0  ;;  %vm360_vm14 = vcmp.eq.s32.totalorder %v1796_v47, %v1886_v51  ;;  %vm518_vm15 = vcmp.eq.s32.totalorder %v1796_v47, %v1889_v52 }
  0xb3   : > { %v1098_v20 = vadd.f32 %v1034_v30, %v881_v14  ;;  %v435_v39 = vsel %vm360_vm14, %v1865_v29, 0.0  ;;  %v593_v36 = vsel %vm518_vm15, %v1871_v42, 0.0  ;;  %vm740_vm0 = vcmp.eq.s32.totalorder %v1796_v47, %v1916_v5 }
  0xb4   : > { %v880_v22 = vadd.f32 %v816_v16, %v658_v31  ;;  %v657_v23 = vadd.f32 %v593_v36, %v435_v39  ;;  %v815_v28 = vsel %vm740_vm0, %v1877_v48, 0.0  ;;  %vm957_vm1 = vcmp.eq.s32.totalorder %v1796_v47, %v1923_v8 }
  0xb5   : > { %1169 = vmatpush1.msra.mxu0 %v1098_v20  ;;  %v1032_v26 = vsel %vm957_vm1, %v1892_v58, 0.0  ;;  %vm359_vm2 = vcmp.eq.s32.totalorder %v1805_v54, %v1880_v49  ;;  %vm517_vm3 = vcmp.eq.s32.totalorder %v1805_v54, %v1883_v50  ;;  %vm739_vm4 = vcmp.eq.s32.totalorder %v1805_v54, %v1908_v63 }
  0xb6   : > { %v1097_v34 = vadd.f32 %v1033_v17, %v880_v22  ;;  %v879_v27 = vadd.f32 %v815_v28, %v657_v23  ;;  %v434_v33 = vsel %vm359_vm2, %v1859_v21, 0.0  ;;  %v592_v37 = vsel %vm517_vm3, %v1862_v25, 0.0 }
  0xb7   : > { %v656_v43 = vadd.f32 %v592_v37, %v434_v33  ;;  %v814_v47 = vsel %vm739_vm4, %v1868_v41, 0.0  ;;  %vm956_vm5 = vcmp.eq.s32.totalorder %v1805_v54, %v1911_v0  ;;  %vm358_vm6 = vcmp.eq.s32.totalorder %v1805_v54, %v1886_v51 }
  0xb8   : > { %1170 = vmatprep.subr.mxu0 %v1097_v34  ;;  %v1096_v44 = vadd.f32 %v1032_v26, %v879_v27  ;;  %v1031_v53 = vsel %vm956_vm5, %v1874_v45, 0.0  ;;  %v433_v57 = vsel %vm358_vm6, %v1865_v29, 0.0  ;;  %vm516_vm7 = vcmp.eq.s32.totalorder %v1805_v54, %v1889_v52 }
  0xb9   : > { %v878_v61 = vadd.f32 %v814_v47, %v656_v43  ;;  %v591_v32 = vsel %vm516_vm7, %v1871_v42, 0.0  ;;  %vm738_vm8 = vcmp.eq.s32.totalorder %v1805_v54, %v1916_v5  ;;  %vm955_vm9 = vcmp.eq.s32.totalorder %v1805_v54, %v1923_v8 }
  0xba   : > { %1171 = vmatpush1.msra.mxu0 %v1096_v44  ;;  %v655_v40 = vadd.f32 %v591_v32, %v433_v57  ;;  %v813_v62 = vsel %vm738_vm8, %v1877_v48, 0.0  ;;  %v1030_v1 = vsel %vm955_vm9, %v1892_v58, 0.0  ;;  %vm357_vm10 = vcmp.eq.s32.totalorder %v1808_v55, %v1880_v49 }
  0xbb   : > { %v1095_v35 = vadd.f32 %v1031_v53, %v878_v61  ;;  %v432_v38 = vsel %vm357_vm10, %v1859_v21, 0.0  ;;  %vm515_vm11 = vcmp.eq.s32.totalorder %v1808_v55, %v1883_v50  ;;  %vm737_vm12 = vcmp.eq.s32.totalorder %v1808_v55, %v1908_v63 }
  0xbc   : > { %v877_v2 = vadd.f32 %v813_v62, %v655_v40  ;;  %v590_v54 = vsel %vm515_vm11, %v1862_v25, 0.0  ;;  %v812_v4 = vsel %vm737_vm12, %v1868_v41, 0.0  ;;  %vm954_vm13 = vcmp.eq.s32.totalorder %v1808_v55, %v1911_v0 }
  0xbd   : > { %1172 = vmatprep.subr.mxu0 %v1095_v35  ;;  %v654_v6 = vadd.f32 %v590_v54, %v432_v38  ;;  %v1029_v30 = vsel %vm954_vm13, %v1874_v45, 0.0  ;;  %vm356_vm14 = vcmp.eq.s32.totalorder %v1808_v55, %v1886_v51  ;;  %vm514_vm15 = vcmp.eq.s32.totalorder %v1808_v55, %v1889_v52 }
  0xbe   : > { %v1094_v12 = vadd.f32 %v1030_v1, %v877_v2  ;;  %v431_v13 = vsel %vm356_vm14, %v1865_v29, 0.0  ;;  %v589_v14 = vsel %vm514_vm15, %v1871_v42, 0.0  ;;  %vm736_vm0 = vcmp.eq.s32.totalorder %v1808_v55, %v1916_v5 }
  0xbf   : > { %v876_v46 = vadd.f32 %v812_v4, %v654_v6  ;;  %v653_v16 = vadd.f32 %v589_v14, %v431_v13  ;;  %v811_v31 = vsel %vm736_vm0, %v1877_v48, 0.0  ;;  %vm953_vm1 = vcmp.eq.s32.totalorder %v1808_v55, %v1923_v8 }
  0xc0   : > { %1173 = vmatpush1.msra.mxu0 %v1094_v12  ;;  %v1028_v17 = vsel %vm953_vm1, %v1892_v58, 0.0  ;;  %vm355_vm2 = vcmp.eq.s32.totalorder %v1811_v56, %v1880_v49  ;;  %vm513_vm3 = vcmp.eq.s32.totalorder %v1811_v56, %v1883_v50  ;;  %vm735_vm4 = vcmp.eq.s32.totalorder %v1811_v56, %v1908_v63 }
  0xc1   : > { %v1093_v20 = vadd.f32 %v1029_v30, %v876_v46  ;;  %v875_v39 = vadd.f32 %v811_v31, %v653_v16  ;;  %v430_v36 = vsel %vm355_vm2, %v1859_v21, 0.0  ;;  %v588_v22 = vsel %vm513_vm3, %v1862_v25, 0.0 }
  0xc2   : > { %v652_v23 = vadd.f32 %v588_v22, %v430_v36  ;;  %v810_v55 = vsel %vm735_vm4, %v1868_v41, 0.0  ;;  %vm952_vm5 = vcmp.eq.s32.totalorder %v1811_v56, %v1911_v0  ;;  %vm354_vm6 = vcmp.eq.s32.totalorder %v1811_v56, %v1886_v51 }
  0xc3   : > { %1174 = vmatprep.subr.mxu0 %v1093_v20  ;;  %v1092_v28 = vadd.f32 %v1028_v17, %v875_v39  ;;  %v1027_v26 = vsel %vm952_vm5, %v1874_v45, 0.0  ;;  %v429_v34 = vsel %vm354_vm6, %v1865_v29, 0.0  ;;  %vm512_vm7 = vcmp.eq.s32.totalorder %v1811_v56, %v1889_v52 }
  0xc4   : > { %v874_v27 = vadd.f32 %v810_v55, %v652_v23  ;;  %v587_v33 = vsel %vm512_vm7, %v1871_v42, 0.0  ;;  %vm734_vm8 = vcmp.eq.s32.totalorder %v1811_v56, %v1916_v5  ;;  %vm951_vm9 = vcmp.eq.s32.totalorder %v1811_v56, %v1923_v8 }
  0xc5   : > { %1175 = vmatpush1.msra.mxu0 %v1092_v28  ;;  %v651_v37 = vadd.f32 %v587_v33, %v429_v34  ;;  %v809_v43 = vsel %vm734_vm8, %v1877_v48, 0.0  ;;  %v1026_v47 = vsel %vm951_vm9, %v1892_v58, 0.0  ;;  %vm353_vm10 = vcmp.eq.s32.totalorder %v1819_v60, %v1880_v49 }
  0xc6   : > { %v1091_v44 = vadd.f32 %v1027_v26, %v874_v27  ;;  %v428_v53 = vsel %vm353_vm10, %v1859_v21, 0.0  ;;  %vm511_vm11 = vcmp.eq.s32.totalorder %v1819_v60, %v1883_v50  ;;  %vm733_vm12 = vcmp.eq.s32.totalorder %v1819_v60, %v1908_v63 }
  0xc7   : > { %v873_v57 = vadd.f32 %v809_v43, %v651_v37  ;;  %v586_v56 = vsel %vm511_vm11, %v1862_v25, 0.0  ;;  %v808_v61 = vsel %vm733_vm12, %v1868_v41, 0.0  ;;  %vm950_vm13 = vcmp.eq.s32.totalorder %v1819_v60, %v1911_v0 }
  0xc8   : > { %1176 = vmatprep.subr.mxu0 %v1091_v44  ;;  %v650_v32 = vadd.f32 %v586_v56, %v428_v53  ;;  %v1025_v40 = vsel %vm950_vm13, %v1874_v45, 0.0  ;;  %vm352_vm14 = vcmp.eq.s32.totalorder %v1819_v60, %v1886_v51  ;;  %vm510_vm15 = vcmp.eq.s32.totalorder %v1819_v60, %v1889_v52 }
  0xc9   : > { %v1090_v62 = vadd.f32 %v1026_v47, %v873_v57  ;;  %v427_v1 = vsel %vm352_vm14, %v1865_v29, 0.0  ;;  %v585_v35 = vsel %vm510_vm15, %v1871_v42, 0.0  ;;  %vm732_vm0 = vcmp.eq.s32.totalorder %v1819_v60, %v1916_v5 }
  0xca   : > { %v872_v38 = vadd.f32 %v808_v61, %v650_v32  ;;  %v649_v2 = vadd.f32 %v585_v35, %v427_v1  ;;  %v807_v54 = vsel %vm732_vm0, %v1877_v48, 0.0  ;;  %vm949_vm1 = vcmp.eq.s32.totalorder %v1819_v60, %v1923_v8 }
  0xcb   : > { %1177 = vmatpush1.msra.mxu0 %v1090_v62  ;;  %v1024_v4 = vsel %vm949_vm1, %v1892_v58, 0.0  ;;  %vm351_vm2 = vcmp.eq.s32.totalorder %v1825_v3, %v1880_v49  ;;  %vm509_vm3 = vcmp.eq.s32.totalorder %v1825_v3, %v1883_v50  ;;  %vm731_vm4 = vcmp.eq.s32.totalorder %v1825_v3, %v1908_v63 }
  0xcc   : > { %v1089_v6 = vadd.f32 %v1025_v40, %v872_v38  ;;  %v871_v30 = vadd.f32 %v807_v54, %v649_v2  ;;  %v426_v12 = vsel %vm351_vm2, %v1859_v21, 0.0  ;;  %v584_v13 = vsel %vm509_vm3, %v1862_v25, 0.0 }
  0xcd   : > { %v648_v14 = vadd.f32 %v584_v13, %v426_v12  ;;  %v806_v60 = vsel %vm731_vm4, %v1868_v41, 0.0  ;;  %vm948_vm5 = vcmp.eq.s32.totalorder %v1825_v3, %v1911_v0  ;;  %vm350_vm6 = vcmp.eq.s32.totalorder %v1825_v3, %v1886_v51 }
  0xce   : > { %1178 = vmatprep.subr.mxu0 %v1089_v6  ;;  %v1088_v46 = vadd.f32 %v1024_v4, %v871_v30  ;;  %v1023_v16 = vsel %vm948_vm5, %v1874_v45, 0.0  ;;  %v425_v31 = vsel %vm350_vm6, %v1865_v29, 0.0  ;;  %vm508_vm7 = vcmp.eq.s32.totalorder %v1825_v3, %v1889_v52 }
  0xcf   : > { %v870_v17 = vadd.f32 %v806_v60, %v648_v14  ;;  %v583_v20 = vsel %vm508_vm7, %v1871_v42, 0.0  ;;  %vm730_vm8 = vcmp.eq.s32.totalorder %v1825_v3, %v1916_v5  ;;  %vm947_vm9 = vcmp.eq.s32.totalorder %v1825_v3, %v1923_v8 }
  0xd0   : > { %1179 = vmatpush1.msra.mxu0 %v1088_v46  ;;  %v647_v39 = vadd.f32 %v583_v20, %v425_v31  ;;  %v805_v36 = vsel %vm730_vm8, %v1877_v48, 0.0  ;;  %v1022_v22 = vsel %vm947_vm9, %v1892_v58, 0.0  ;;  %vm349_vm10 = vcmp.eq.s32.totalorder %v1756_v24, %v1880_v49 }
  0xd1   : > { %v1087_v23 = vadd.f32 %v1023_v16, %v870_v17  ;;  %v424_v55 = vsel %vm349_vm10, %v1859_v21, 0.0  ;;  %vm507_vm11 = vcmp.eq.s32.totalorder %v1756_v24, %v1883_v50  ;;  %vm729_vm12 = vcmp.eq.s32.totalorder %v1756_v24, %v1908_v63 }
  0xd2   : > { %v869_v28 = vadd.f32 %v805_v36, %v647_v39  ;;  %v582_v3 = vsel %vm507_vm11, %v1862_v25, 0.0  ;;  %v804_v26 = vsel %vm729_vm12, %v1868_v41, 0.0  ;;  %vm946_vm13 = vcmp.eq.s32.totalorder %v1756_v24, %v1911_v0 }
  0xd3   : > { %1180 = vmatprep.subr.mxu0 %v1087_v23  ;;  %v646_v34 = vadd.f32 %v582_v3, %v424_v55  ;;  %v1021_v27 = vsel %vm946_vm13, %v1874_v45, 0.0  ;;  %vm348_vm14 = vcmp.eq.s32.totalorder %v1756_v24, %v1886_v51  ;;  %vm506_vm15 = vcmp.eq.s32.totalorder %v1756_v24, %v1889_v52 }
  0xd4   : > { %v1086_v33 = vadd.f32 %v1022_v22, %v869_v28  ;;  %v423_v37 = vsel %vm348_vm14, %v1865_v29, 0.0  ;;  %v581_v43 = vsel %vm506_vm15, %v1871_v42, 0.0  ;;  %vm728_vm0 = vcmp.eq.s32.totalorder %v1756_v24, %v1916_v5 }
  0xd5   : > { %v868_v47 = vadd.f32 %v804_v26, %v646_v34  ;;  %v645_v44 = vadd.f32 %v581_v43, %v423_v37  ;;  %v803_v53 = vsel %vm728_vm0, %v1877_v48, 0.0  ;;  %vm945_vm1 = vcmp.eq.s32.totalorder %v1756_v24, %v1923_v8 }
  0xd6   : > { %1181 = vmatpush1.msra.mxu0 %v1086_v33  ;;  %v1020_v57 = vsel %vm945_vm1, %v1892_v58, 0.0  ;;  %vm411_vm2 = vcmp.eq.s32.totalorder %v1831_v7, %v1880_v49  ;;  %vm569_vm3 = vcmp.eq.s32.totalorder %v1831_v7, %v1883_v50  ;;  %vm791_vm4 = vcmp.eq.s32.totalorder %v1831_v7, %v1908_v63 }
  0xd7   : > { %v1085_v56 = vadd.f32 %v1021_v27, %v868_v47  ;;  %v867_v61 = vadd.f32 %v803_v53, %v645_v44  ;;  %v486_v32 = vsel %vm411_vm2, %v1859_v21, 0.0  ;;  %v644_v40 = vsel %vm569_vm3, %v1862_v25, 0.0 }
  0xd8   : > { %v708_v62 = vadd.f32 %v644_v40, %v486_v32  ;;  %v866_v1 = vsel %vm791_vm4, %v1868_v41, 0.0  ;;  %vm1008_vm5 = vcmp.eq.s32.totalorder %v1831_v7, %v1911_v0  ;;  %vm410_vm6 = vcmp.eq.s32.totalorder %v1831_v7, %v1886_v51 }
  0xd9   : > { %1182 = vmatprep.subr.mxu0 %v1085_v56  ;;  %v1084_v35 = vadd.f32 %v1020_v57, %v867_v61  ;;  %v1083_v38 = vsel %vm1008_vm5, %v1874_v45, 0.0  ;;  %v485_v2 = vsel %vm410_vm6, %v1865_v29, 0.0  ;;  %vm568_vm7 = vcmp.eq.s32.totalorder %v1831_v7, %v1889_v52 }
  0xda   : > { %v930_v54 = vadd.f32 %v866_v1, %v708_v62  ;;  %v643_v4 = vsel %vm568_vm7, %v1871_v42, 0.0  ;;  %vm790_vm8 = vcmp.eq.s32.totalorder %v1831_v7, %v1916_v5  ;;  %vm1007_vm9 = vcmp.eq.s32.totalorder %v1831_v7, %v1923_v8 }
  0xdb   : > { %1183 = vmatpush1.msra.mxu0 %v1084_v35  ;;  %v707_v6 = vadd.f32 %v643_v4, %v485_v2  ;;  %v865_v30 = vsel %vm790_vm8, %v1877_v48, 0.0  ;;  %v1082_v12 = vsel %vm1007_vm9, %v1892_v58, 0.0  ;;  %vm409_vm10 = vcmp.eq.s32.totalorder %v1837_v9, %v1880_v49 }
  0xdc   : > { %v1147_v13 = vadd.f32 %v1083_v38, %v930_v54  ;;  %v484_v14 = vsel %vm409_vm10, %v1859_v21, 0.0  ;;  %vm567_vm11 = vcmp.eq.s32.totalorder %v1837_v9, %v1883_v50  ;;  %vm789_vm12 = vcmp.eq.s32.totalorder %v1837_v9, %v1908_v63 }
  0xdd   : > { %v929_v60 = vadd.f32 %v865_v30, %v707_v6  ;;  %v642_v7 = vsel %vm567_vm11, %v1862_v25, 0.0  ;;  %v864_v46 = vsel %vm789_vm12, %v1868_v41, 0.0  ;;  %vm1006_vm13 = vcmp.eq.s32.totalorder %v1837_v9, %v1911_v0 }
  0xde   : > { %1184 = vmatprep.subr.mxu0 %v1147_v13  ;;  %v706_v16 = vadd.f32 %v642_v7, %v484_v14  ;;  %v1081_v31 = vsel %vm1006_vm13, %v1874_v45, 0.0  ;;  %vm408_vm14 = vcmp.eq.s32.totalorder %v1837_v9, %v1886_v51  ;;  %vm566_vm15 = vcmp.eq.s32.totalorder %v1837_v9, %v1889_v52 }
  0xdf   : > { %v1146_v17 = vadd.f32 %v1082_v12, %v929_v60  ;;  %v483_v20 = vsel %vm408_vm14, %v1865_v29, 0.0  ;;  %v641_v39 = vsel %vm566_vm15, %v1871_v42, 0.0  ;;  %vm788_vm0 = vcmp.eq.s32.totalorder %v1837_v9, %v1916_v5 }
  0xe0   : > { %v928_v36 = vadd.f32 %v864_v46, %v706_v16  ;;  %v705_v22 = vadd.f32 %v641_v39, %v483_v20  ;;  %v863_v23 = vsel %vm788_vm0, %v1877_v48, 0.0  ;;  %vm1005_vm1 = vcmp.eq.s32.totalorder %v1837_v9, %v1923_v8 }
  0xe1   : > { %1185 = vmatpush2.msra.mxu0 %v1146_v17  ;;  %v1080_v55 = vsel %vm1005_vm1, %v1892_v58, 0.0  ;;  %vm407_vm2 = vcmp.eq.s32.totalorder %v1840_v10, %v1880_v49  ;;  %vm565_vm3 = vcmp.eq.s32.totalorder %v1840_v10, %v1883_v50  ;;  %vm787_vm4 = vcmp.eq.s32.totalorder %v1840_v10, %v1908_v63 }
  0xe2   : > { %v1145_v28 = vadd.f32 %v1081_v31, %v928_v36  ;;  %v927_v3 = vadd.f32 %v863_v23, %v705_v22  ;;  %v482_v26 = vsel %vm407_vm2, %v1859_v21, 0.0  ;;  %v640_v34 = vsel %vm565_vm3, %v1862_v25, 0.0 }
  0xe3   : > { %v704_v27 = vadd.f32 %v640_v34, %v482_v26  ;;  %v862_v9 = vsel %vm787_vm4, %v1868_v41, 0.0  ;;  %vm1004_vm5 = vcmp.eq.s32.totalorder %v1840_v10, %v1911_v0  ;;  %vm406_vm6 = vcmp.eq.s32.totalorder %v1840_v10, %v1886_v51 }
  0xe4   : > { %1186 = vmatprep.subr.mxu0 %v1145_v28  ;;  %v1144_v33 = vadd.f32 %v1080_v55, %v927_v3  ;;  %v1079_v37 = vsel %vm1004_vm5, %v1874_v45, 0.0  ;;  %v481_v43 = vsel %vm406_vm6, %v1865_v29, 0.0  ;;  %vm564_vm7 = vcmp.eq.s32.totalorder %v1840_v10, %v1889_v52 }
  0xe5   : > { %v926_v47 = vadd.f32 %v862_v9, %v704_v27  ;;  %v639_v44 = vsel %vm564_vm7, %v1871_v42, 0.0  ;;  %vm786_vm8 = vcmp.eq.s32.totalorder %v1840_v10, %v1916_v5  ;;  %vm1003_vm9 = vcmp.eq.s32.totalorder %v1840_v10, %v1923_v8 }
  0xe6   : > { %1187 = vmatpush2.msra.mxu0 %v1144_v33  ;;  %v703_v53 = vadd.f32 %v639_v44, %v481_v43  ;;  %v861_v57 = vsel %vm786_vm8, %v1877_v48, 0.0  ;;  %v1078_v56 = vsel %vm1003_vm9, %v1892_v58, 0.0  ;;  %vm405_vm10 = vcmp.eq.s32.totalorder %v1843_v11, %v1880_v49 }
  0xe7   : > { %v1143_v61 = vadd.f32 %v1079_v37, %v926_v47  ;;  %v480_v32 = vsel %vm405_vm10, %v1859_v21, 0.0  ;;  %vm563_vm11 = vcmp.eq.s32.totalorder %v1843_v11, %v1883_v50  ;;  %vm785_vm12 = vcmp.eq.s32.totalorder %v1843_v11, %v1908_v63 }
  0xe8   : > { %v925_v40 = vadd.f32 %v861_v57, %v703_v53  ;;  %v638_v10 = vsel %vm563_vm11, %v1862_v25, 0.0  ;;  %v860_v62 = vsel %vm785_vm12, %v1868_v41, 0.0  ;;  %vm1002_vm13 = vcmp.eq.s32.totalorder %v1843_v11, %v1911_v0 }
  0xe9   : > { %1188 = vmatprep.subr.mxu0 %v1143_v61  ;;  %v702_v1 = vadd.f32 %v638_v10, %v480_v32  ;;  %v1077_v35 = vsel %vm1002_vm13, %v1874_v45, 0.0  ;;  %vm404_vm14 = vcmp.eq.s32.totalorder %v1843_v11, %v1886_v51  ;;  %vm562_vm15 = vcmp.eq.s32.totalorder %v1843_v11, %v1889_v52 }
  0xea   : > { %v1142_v38 = vadd.f32 %v1078_v56, %v925_v40  ;;  %v479_v2 = vsel %vm404_vm14, %v1865_v29, 0.0  ;;  %v637_v54 = vsel %vm562_vm15, %v1871_v42, 0.0  ;;  %vm784_vm0 = vcmp.eq.s32.totalorder %v1843_v11, %v1916_v5 }
  0xeb   : > { %v924_v4 = vadd.f32 %v860_v62, %v702_v1  ;;  %v701_v6 = vadd.f32 %v637_v54, %v479_v2  ;;  %v859_v30 = vsel %vm784_vm0, %v1877_v48, 0.0  ;;  %vm1001_vm1 = vcmp.eq.s32.totalorder %v1843_v11, %v1923_v8 }
  0xec   : > { %1189 = vmatpush2.msra.mxu0 %v1142_v38  ;;  %v1076_v12 = vsel %vm1001_vm1, %v1892_v58, 0.0  ;;  %vm403_vm2 = vcmp.eq.s32.totalorder %v1849_v15, %v1880_v49  ;;  %vm561_vm3 = vcmp.eq.s32.totalorder %v1849_v15, %v1883_v50  ;;  %vm783_vm4 = vcmp.eq.s32.totalorder %v1849_v15, %v1908_v63 }
  0xed   : > { %v1141_v13 = vadd.f32 %v1077_v35, %v924_v4  ;;  %v923_v14 = vadd.f32 %v859_v30, %v701_v6  ;;  %v478_v60 = vsel %vm403_vm2, %v1859_v21, 0.0  ;;  %v636_v7 = vsel %vm561_vm3, %v1862_v25, 0.0 }
  0xee   : > { %v700_v46 = vadd.f32 %v636_v7, %v478_v60  ;;  %v858_v11 = vsel %vm783_vm4, %v1868_v41, 0.0  ;;  %vm1000_vm5 = vcmp.eq.s32.totalorder %v1849_v15, %v1911_v0  ;;  %vm402_vm6 = vcmp.eq.s32.totalorder %v1849_v15, %v1886_v51 }
  0xef   : > { %1190 = vmatprep.subr.mxu0 %v1141_v13  ;;  %v1140_v16 = vadd.f32 %v1076_v12, %v923_v14  ;;  %v1075_v31 = vsel %vm1000_vm5, %v1874_v45, 0.0  ;;  %v477_v17 = vsel %vm402_vm6, %v1865_v29, 0.0  ;;  %vm560_vm7 = vcmp.eq.s32.totalorder %v1849_v15, %v1889_v52 }
  0xf0   : > { %v922_v20 = vadd.f32 %v858_v11, %v700_v46  ;;  %v635_v39 = vsel %vm560_vm7, %v1871_v42, 0.0  ;;  %vm782_vm8 = vcmp.eq.s32.totalorder %v1849_v15, %v1916_v5  ;;  %vm999_vm9 = vcmp.eq.s32.totalorder %v1849_v15, %v1923_v8 }
  0xf1   : > { %1191 = vmatpush2.msra.mxu0 %v1140_v16  ;;  %v699_v36 = vadd.f32 %v635_v39, %v477_v17  ;;  %v857_v22 = vsel %vm782_vm8, %v1877_v48, 0.0  ;;  %v1074_v23 = vsel %vm999_vm9, %v1892_v58, 0.0  ;;  %vm401_vm10 = vcmp.eq.s32.totalorder %v1853_v18, %v1880_v49 }
  0xf2   : > { %v1139_v55 = vadd.f32 %v1075_v31, %v922_v20  ;;  %v476_v28 = vsel %vm401_vm10, %v1859_v21, 0.0  ;;  %vm559_vm11 = vcmp.eq.s32.totalorder %v1853_v18, %v1883_v50  ;;  %vm781_vm12 = vcmp.eq.s32.totalorder %v1853_v18, %v1908_v63 }
  0xf3   : > { %v921_v3 = vadd.f32 %v857_v22, %v699_v36  ;;  %v634_v15 = vsel %vm559_vm11, %v1862_v25, 0.0  ;;  %v856_v26 = vsel %vm781_vm12, %v1868_v41, 0.0  ;;  %vm998_vm13 = vcmp.eq.s32.totalorder %v1853_v18, %v1911_v0 }
  0xf4   : > { %1192 = vmatprep.subr.mxu0 %v1139_v55  ;;  %v698_v34 = vadd.f32 %v634_v15, %v476_v28  ;;  %v1073_v27 = vsel %vm998_vm13, %v1874_v45, 0.0  ;;  %vm400_vm14 = vcmp.eq.s32.totalorder %v1853_v18, %v1886_v51  ;;  %vm558_vm15 = vcmp.eq.s32.totalorder %v1853_v18, %v1889_v52 }
  0xf5   : > { %v1138_v9 = vadd.f32 %v1074_v23, %v921_v3  ;;  %v475_v33 = vsel %vm400_vm14, %v1865_v29, 0.0  ;;  %v633_v37 = vsel %vm558_vm15, %v1871_v42, 0.0  ;;  %vm780_vm0 = vcmp.eq.s32.totalorder %v1853_v18, %v1916_v5 }
  0xf6   : > { %v920_v43 = vadd.f32 %v856_v26, %v698_v34  ;;  %v697_v47 = vadd.f32 %v633_v37, %v475_v33  ;;  %v855_v44 = vsel %vm780_vm0, %v1877_v48, 0.0  ;;  %vm997_vm1 = vcmp.eq.s32.totalorder %v1853_v18, %v1923_v8 }
  0xf7   : > { %1193 = vmatpush2.msra.mxu0 %v1138_v9  ;;  %v1072_v53 = vsel %vm997_vm1, %v1892_v58, 0.0  ;;  %vm399_vm2 = vcmp.eq.s32.totalorder %v1856_v19, %v1880_v49  ;;  %vm557_vm3 = vcmp.eq.s32.totalorder %v1856_v19, %v1883_v50  ;;  %vm779_vm4 = vcmp.eq.s32.totalorder %v1856_v19, %v1908_v63 }
  0xf8   : > { %v1137_v57 = vadd.f32 %v1073_v27, %v920_v43  ;;  %v919_v56 = vadd.f32 %v855_v44, %v697_v47  ;;  %v474_v61 = vsel %vm399_vm2, %v1859_v21, 0.0  ;;  %v632_v32 = vsel %vm557_vm3, %v1862_v25, 0.0 }
  0xf9   : > { %v696_v40 = vadd.f32 %v632_v32, %v474_v61  ;;  %v854_v18 = vsel %vm779_vm4, %v1868_v41, 0.0  ;;  %vm996_vm5 = vcmp.eq.s32.totalorder %v1856_v19, %v1911_v0  ;;  %vm398_vm6 = vcmp.eq.s32.totalorder %v1856_v19, %v1886_v51 }
  0xfa   : > { %1194 = vmatprep.subr.mxu0 %v1137_v57  ;;  %v1136_v10 = vadd.f32 %v1072_v53, %v919_v56  ;;  %v1071_v62 = vsel %vm996_vm5, %v1874_v45, 0.0  ;;  %v473_v1 = vsel %vm398_vm6, %v1865_v29, 0.0  ;;  %vm556_vm7 = vcmp.eq.s32.totalorder %v1856_v19, %v1889_v52 }
  0xfb   : > { %v918_v35 = vadd.f32 %v854_v18, %v696_v40  ;;  %v631_v38 = vsel %vm556_vm7, %v1871_v42, 0.0  ;;  %vm778_vm8 = vcmp.eq.s32.totalorder %v1856_v19, %v1916_v5  ;;  %vm995_vm9 = vcmp.eq.s32.totalorder %v1856_v19, %v1923_v8 }
  0xfc   : > { %1195 = vmatpush2.msra.mxu0 %v1136_v10  ;;  %v695_v2 = vadd.f32 %v631_v38, %v473_v1  ;;  %v853_v54 = vsel %vm778_vm8, %v1877_v48, 0.0  ;;  %v1070_v4 = vsel %vm995_vm9, %v1892_v58, 0.0  ;;  %vm397_vm10 = vcmp.eq.s32.totalorder %v1895_v59, %v1880_v49 }
  0xfd   : > { %v1135_v6 = vadd.f32 %v1071_v62, %v918_v35  ;;  %v472_v30 = vsel %vm397_vm10, %v1859_v21, 0.0  ;;  %vm555_vm11 = vcmp.eq.s32.totalorder %v1895_v59, %v1883_v50  ;;  %vm777_vm12 = vcmp.eq.s32.totalorder %v1895_v59, %v1908_v63 }
  0xfe   : > { %v917_v12 = vadd.f32 %v853_v54, %v695_v2  ;;  %v630_v19 = vsel %vm555_vm11, %v1862_v25, 0.0  ;;  %v852_v13 = vsel %vm777_vm12, %v1868_v41, 0.0  ;;  %vm994_vm13 = vcmp.eq.s32.totalorder %v1895_v59, %v1911_v0 }
  0xff   : > { %1196 = vmatprep.subr.mxu0 %v1135_v6  ;;  %v694_v14 = vadd.f32 %v630_v19, %v472_v30  ;;  %v1069_v60 = vsel %vm994_vm13, %v1874_v45, 0.0  ;;  %vm396_vm14 = vcmp.eq.s32.totalorder %v1895_v59, %v1886_v51  ;;  %vm554_vm15 = vcmp.eq.s32.totalorder %v1895_v59, %v1889_v52 }
 0x100   : > { %v1134_v7 = vadd.f32 %v1070_v4, %v917_v12  ;;  %v471_v46 = vsel %vm396_vm14, %v1865_v29, 0.0  ;;  %v629_v11 = vsel %vm554_vm15, %v1871_v42, 0.0  ;;  %vm776_vm0 = vcmp.eq.s32.totalorder %v1895_v59, %v1916_v5 }
 0x101   : > { %v916_v16 = vadd.f32 %v852_v13, %v694_v14  ;;  %v693_v31 = vadd.f32 %v629_v11, %v471_v46  ;;  %v851_v17 = vsel %vm776_vm0, %v1877_v48, 0.0  ;;  %vm993_vm1 = vcmp.eq.s32.totalorder %v1895_v59, %v1923_v8 }
 0x102   : > { %1197 = vmatpush2.msra.mxu0 %v1134_v7  ;;  %v1068_v20 = vsel %vm993_vm1, %v1892_v58, 0.0  ;;  %v315_v39 = vadd.s32 184, %v1756_v24  ;;  %v314_v36 = vadd.s32 176, %v1756_v24  ;;  %v2488_v22 = vadd.s32 168, %v1756_v24 }
 0x103   : > { %v1133_v23 = vadd.f32 %v1069_v60, %v916_v16  ;;  %v915_v55 = vadd.f32 %v851_v17, %v693_v31  ;;  %v2491_v28 = vadd.s32 160, %v1756_v24  ;;  %v2494_v3 = vadd.s32 152, %v1756_v24 }
 0x104   : > { %vm395_vm2 = vcmp.eq.s32.totalorder %v315_v39, %v1880_v49  ;;  %vm553_vm3 = vcmp.eq.s32.totalorder %v315_v39, %v1883_v50  ;;  %vm775_vm4 = vcmp.eq.s32.totalorder %v315_v39, %v1908_v63  ;;  %vm992_vm5 = vcmp.eq.s32.totalorder %v315_v39, %v1911_v0 }
 0x105   : > { %1198 = vmatprep.subr.mxu0 %v1133_v23  ;;  %v1132_v59 = vadd.f32 %v1068_v20, %v915_v55  ;;  %v470_v15 = vsel %vm395_vm2, %v1859_v21, 0.0  ;;  %v628_v26 = vsel %vm553_vm3, %v1862_v25, 0.0  ;;  %v850_v34 = vsel %vm775_vm4, %v1868_v41, 0.0 }
 0x106   : > { %v692_v27 = vadd.f32 %v628_v26, %v470_v15  ;;  %v1067_v9 = vsel %vm992_vm5, %v1874_v45, 0.0  ;;  %vm394_vm6 = vcmp.eq.s32.totalorder %v315_v39, %v1886_v51  ;;  %vm552_vm7 = vcmp.eq.s32.totalorder %v315_v39, %v1889_v52 }
 0x107   : > { %1199 = vmatpush2.msra.mxu0 %v1132_v59  ;;  %v469_v33 = vsel %vm394_vm6, %v1865_v29, 0.0  ;;  %v627_v37 = vsel %vm552_vm7, %v1871_v42, 0.0  ;;  %vm774_vm8 = vcmp.eq.s32.totalorder %v315_v39, %v1916_v5  ;;  %vm991_vm9 = vcmp.eq.s32.totalorder %v315_v39, %v1923_v8 }
 0x108   : > { %v914_v43 = vadd.f32 %v850_v34, %v692_v27  ;;  %v691_v47 = vadd.f32 %v627_v37, %v469_v33  ;;  %v849_v44 = vsel %vm774_vm8, %v1877_v48, 0.0  ;;  %v1066_v53 = vsel %vm991_vm9, %v1892_v58, 0.0 }
 0x109   : > { %vm393_vm10 = vcmp.eq.s32.totalorder %v314_v36, %v1880_v49  ;;  %vm551_vm11 = vcmp.eq.s32.totalorder %v314_v36, %v1883_v50  ;;  %vm773_vm12 = vcmp.eq.s32.totalorder %v314_v36, %v1908_v63  ;;  %vm990_vm13 = vcmp.eq.s32.totalorder %v314_v36, %v1911_v0 }
 0x10a   : > { %v1131_v57 = vadd.f32 %v1067_v9, %v914_v43  ;;  %v913_v56 = vadd.f32 %v849_v44, %v691_v47  ;;  %v468_v61 = vsel %vm393_vm10, %v1859_v21, 0.0  ;;  %v626_v32 = vsel %vm551_vm11, %v1862_v25, 0.0 }
 0x10b   : > { %v690_v40 = vadd.f32 %v626_v32, %v468_v61  ;;  %v848_v18 = vsel %vm773_vm12, %v1868_v41, 0.0  ;;  %v1065_v10 = vsel %vm990_vm13, %v1874_v45, 0.0  ;;  %vm392_vm14 = vcmp.eq.s32.totalorder %v314_v36, %v1886_v51 }
 0x10c   : > { %1200 = vmatprep.subr.mxu0 %v1131_v57  ;;  %v1130_v62 = vadd.f32 %v1066_v53, %v913_v56  ;;  %v467_v1 = vsel %vm392_vm14, %v1865_v29, 0.0  ;;  %vm550_vm15 = vcmp.eq.s32.totalorder %v314_v36, %v1889_v52  ;;  %vm772_vm0 = vcmp.eq.s32.totalorder %v314_v36, %v1916_v5 }
 0x10d   : > { %v912_v35 = vadd.f32 %v848_v18, %v690_v40  ;;  %v625_v38 = vsel %vm550_vm15, %v1871_v42, 0.0  ;;  %v847_v2 = vsel %vm772_vm0, %v1877_v48, 0.0  ;;  %vm989_vm1 = vcmp.eq.s32.totalorder %v314_v36, %v1923_v8 }
 0x10e   : > { %1201 = vmatpush2.msra.mxu0 %v1130_v62  ;;  %v689_v54 = vadd.f32 %v625_v38, %v467_v1  ;;  %v1064_v4 = vsel %vm989_vm1, %v1892_v58, 0.0  ;;  %vm391_vm2 = vcmp.eq.s32.totalorder %v2488_v22, %v1880_v49  ;;  %vm549_vm3 = vcmp.eq.s32.totalorder %v2488_v22, %v1883_v50 }
 0x10f   : > { %v1129_v6 = vadd.f32 %v1065_v10, %v912_v35  ;;  %v466_v30 = vsel %vm391_vm2, %v1859_v21, 0.0  ;;  %v624_v12 = vsel %vm549_vm3, %v1862_v25, 0.0  ;;  %vm771_vm4 = vcmp.eq.s32.totalorder %v2488_v22, %v1908_v63 }
 0x110   : > { %v911_v19 = vadd.f32 %v847_v2, %v689_v54  ;;  %v688_v13 = vadd.f32 %v624_v12, %v466_v30  ;;  %v846_v14 = vsel %vm771_vm4, %v1868_v41, 0.0  ;;  %vm988_vm5 = vcmp.eq.s32.totalorder %v2488_v22, %v1911_v0 }
 0x111   : > { %1202 = vmatprep.subr.mxu0 %v1129_v6  ;;  %v1063_v60 = vsel %vm988_vm5, %v1874_v45, 0.0  ;;  %vm390_vm6 = vcmp.eq.s32.totalorder %v2488_v22, %v1886_v51  ;;  %vm548_vm7 = vcmp.eq.s32.totalorder %v2488_v22, %v1889_v52  ;;  %vm770_vm8 = vcmp.eq.s32.totalorder %v2488_v22, %v1916_v5 }
 0x112   : > { %v1128_v7 = vadd.f32 %v1064_v4, %v911_v19  ;;  %v910_v46 = vadd.f32 %v846_v14, %v688_v13  ;;  %v465_v11 = vsel %vm390_vm6, %v1865_v29, 0.0  ;;  %v623_v16 = vsel %vm548_vm7, %v1871_v42, 0.0 }
 0x113   : > { %v687_v31 = vadd.f32 %v623_v16, %v465_v11  ;;  %v845_v17 = vsel %vm770_vm8, %v1877_v48, 0.0  ;;  %vm987_vm9 = vcmp.eq.s32.totalorder %v2488_v22, %v1923_v8  ;;  %vm389_vm10 = vcmp.eq.s32.totalorder %v2491_v28, %v1880_v49 }
 0x114   : > { %1203 = vmatpush2.msra.mxu0 %v1128_v7  ;;  %v1127_v20 = vadd.f32 %v1063_v60, %v910_v46  ;;  %v1062_v39 = vsel %vm987_vm9, %v1892_v58, 0.0  ;;  %v464_v36 = vsel %vm389_vm10, %v1859_v21, 0.0  ;;  %vm547_vm11 = vcmp.eq.s32.totalorder %v2491_v28, %v1883_v50 }
 0x115   : > { %v909_v23 = vadd.f32 %v845_v17, %v687_v31  ;;  %v622_v55 = vsel %vm547_vm11, %v1862_v25, 0.0  ;;  %vm769_vm12 = vcmp.eq.s32.totalorder %v2491_v28, %v1908_v63  ;;  %vm986_vm13 = vcmp.eq.s32.totalorder %v2491_v28, %v1911_v0 }
 0x116   : > { %1204 = vmatprep.subr.mxu0 %v1127_v20  ;;  %v686_v22 = vadd.f32 %v622_v55, %v464_v36  ;;  %v844_v59 = vsel %vm769_vm12, %v1868_v41, 0.0  ;;  %v1061_v15 = vsel %vm986_vm13, %v1874_v45, 0.0  ;;  %vm388_vm14 = vcmp.eq.s32.totalorder %v2491_v28, %v1886_v51 }
 0x117   : > { %v1126_v26 = vadd.f32 %v1062_v39, %v909_v23  ;;  %v463_v34 = vsel %vm388_vm14, %v1865_v29, 0.0  ;;  %vm546_vm15 = vcmp.eq.s32.totalorder %v2491_v28, %v1889_v52  ;;  %vm768_vm0 = vcmp.eq.s32.totalorder %v2491_v28, %v1916_v5 }
 0x118   : > { %v908_v27 = vadd.f32 %v844_v59, %v686_v22  ;;  %v621_v9 = vsel %vm546_vm15, %v1871_v42, 0.0  ;;  %v843_v33 = vsel %vm768_vm0, %v1877_v48, 0.0  ;;  %vm985_vm1 = vcmp.eq.s32.totalorder %v2491_v28, %v1923_v8 }
 0x119   : > { %1205 = vmatpush2.msra.mxu0 %v1126_v26  ;;  %v685_v37 = vadd.f32 %v621_v9, %v463_v34  ;;  %v1060_v43 = vsel %vm985_vm1, %v1892_v58, 0.0  ;;  %vm387_vm2 = vcmp.eq.s32.totalorder %v2494_v3, %v1880_v49  ;;  %vm545_vm3 = vcmp.eq.s32.totalorder %v2494_v3, %v1883_v50 }
 0x11a   : > { %v1125_v47 = vadd.f32 %v1061_v15, %v908_v27  ;;  %v462_v44 = vsel %vm387_vm2, %v1859_v21, 0.0  ;;  %v620_v53 = vsel %vm545_vm3, %v1862_v25, 0.0  ;;  %vm767_vm4 = vcmp.eq.s32.totalorder %v2494_v3, %v1908_v63 }
 0x11b   : > { %v907_v57 = vadd.f32 %v843_v33, %v685_v37  ;;  %v684_v28 = vadd.f32 %v620_v53, %v462_v44  ;;  %v842_v56 = vsel %vm767_vm4, %v1868_v41, 0.0  ;;  %vm984_vm5 = vcmp.eq.s32.totalorder %v2494_v3, %v1911_v0 }
 0x11c   : > { %1206 = vmatprep.subr.mxu0 %v1125_v47  ;;  %v1059_v61 = vsel %vm984_vm5, %v1874_v45, 0.0  ;;  %vm386_vm6 = vcmp.eq.s32.totalorder %v2494_v3, %v1886_v51  ;;  %vm544_vm7 = vcmp.eq.s32.totalorder %v2494_v3, %v1889_v52  ;;  %vm766_vm8 = vcmp.eq.s32.totalorder %v2494_v3, %v1916_v5 }
 0x11d   : > { %v1124_v32 = vadd.f32 %v1060_v43, %v907_v57  ;;  %v906_v40 = vadd.f32 %v842_v56, %v684_v28  ;;  %v461_v18 = vsel %vm386_vm6, %v1865_v29, 0.0  ;;  %v619_v10 = vsel %vm544_vm7, %v1871_v42, 0.0 }
 0x11e   : > { %v683_v62 = vadd.f32 %v619_v10, %v461_v18  ;;  %v841_v1 = vsel %vm766_vm8, %v1877_v48, 0.0  ;;  %vm983_vm9 = vcmp.eq.s32.totalorder %v2494_v3, %v1923_v8  ;;  %v310_v35 = vadd.s32 144, %v1756_v24 }
 0x11f   : > { %1207 = vmatpush2.msra.mxu0 %v1124_v32  ;;  %v1123_v38 = vadd.f32 %v1059_v61, %v906_v40  ;;  %v1058_v2 = vsel %vm983_vm9, %v1892_v58, 0.0  ;;  %v309_v54 = vadd.s32 136, %v1756_v24  ;;  %v2603_v4 = vadd.s32 128, %v1756_v24 }
 0x120   : > { %v905_v6 = vadd.f32 %v841_v1, %v683_v62  ;;  %vm385_vm10 = vcmp.eq.s32.totalorder %v310_v35, %v1880_v49  ;;  %vm543_vm11 = vcmp.eq.s32.totalorder %v310_v35, %v1883_v50  ;;  %vm765_vm12 = vcmp.eq.s32.totalorder %v310_v35, %v1908_v63 }
 0x121   : > { %1208 = vmatprep.subr.mxu0 %v1123_v38  ;;  %v460_v3 = vsel %vm385_vm10, %v1859_v21, 0.0  ;;  %v618_v30 = vsel %vm543_vm11, %v1862_v25, 0.0  ;;  %v840_v12 = vsel %vm765_vm12, %v1868_v41, 0.0  ;;  %vm982_vm13 = vcmp.eq.s32.totalorder %v310_v35, %v1911_v0 }
 0x122   : > { %v1122_v19 = vadd.f32 %v1058_v2, %v905_v6  ;;  %v682_v13 = vadd.f32 %v618_v30, %v460_v3  ;;  %v1057_v24 = vsel %vm982_vm13, %v1874_v45, 0.0  ;;  %vm384_vm14 = vcmp.eq.s32.totalorder %v310_v35, %v1886_v51 }
 0x123   : > { %v459_v14 = vsel %vm384_vm14, %v1865_v29, 0.0  ;;  %vm542_vm15 = vcmp.eq.s32.totalorder %v310_v35, %v1889_v52  ;;  %vm764_vm0 = vcmp.eq.s32.totalorder %v310_v35, %v1916_v5  ;;  %vm981_vm1 = vcmp.eq.s32.totalorder %v310_v35, %v1923_v8 }
 0x124   : > { %1209 = vmatpush2.msra.mxu0 %v1122_v19  ;;  %v904_v60 = vadd.f32 %v840_v12, %v682_v13  ;;  %v617_v7 = vsel %vm542_vm15, %v1871_v42, 0.0  ;;  %v839_v46 = vsel %vm764_vm0, %v1877_v48, 0.0  ;;  %v1056_v11 = vsel %vm981_vm1, %v1892_v58, 0.0 }
 0x125   : > { %v681_v16 = vadd.f32 %v617_v7, %v459_v14  ;;  %vm383_vm2 = vcmp.eq.s32.totalorder %v309_v54, %v1880_v49  ;;  %vm541_vm3 = vcmp.eq.s32.totalorder %v309_v54, %v1883_v50  ;;  %vm763_vm4 = vcmp.eq.s32.totalorder %v309_v54, %v1908_v63 }
 0x126   : > { %v1121_v31 = vadd.f32 %v1057_v24, %v904_v60  ;;  %v458_v17 = vsel %vm383_vm2, %v1859_v21, 0.0  ;;  %v616_v20 = vsel %vm541_vm3, %v1862_v25, 0.0  ;;  %v838_v39 = vsel %vm763_vm4, %v1868_v41, 0.0 }
 0x127   : > { %v903_v36 = vadd.f32 %v839_v46, %v681_v16  ;;  %v680_v23 = vadd.f32 %v616_v20, %v458_v17  ;;  %vm980_vm5 = vcmp.eq.s32.totalorder %v309_v54, %v1911_v0  ;;  %vm382_vm6 = vcmp.eq.s32.totalorder %v309_v54, %v1886_v51 }
 0x128   : > { %1210 = vmatprep.subr.mxu0 %v1121_v31  ;;  %v1055_v55 = vsel %vm980_vm5, %v1874_v45, 0.0  ;;  %v457_v22 = vsel %vm382_vm6, %v1865_v29, 0.0  ;;  %vm540_vm7 = vcmp.eq.s32.totalorder %v309_v54, %v1889_v52  ;;  %vm762_vm8 = vcmp.eq.s32.totalorder %v309_v54, %v1916_v5 }
 0x129   : > { %v1120_v59 = vadd.f32 %v1056_v11, %v903_v36  ;;  %v902_v15 = vadd.f32 %v838_v39, %v680_v23  ;;  %v615_v26 = vsel %vm540_vm7, %v1871_v42, 0.0  ;;  %v837_v34 = vsel %vm762_vm8, %v1877_v48, 0.0 }
 0x12a   : > { %v679_v27 = vadd.f32 %v615_v26, %v457_v22  ;;  %vm979_vm9 = vcmp.eq.s32.totalorder %v309_v54, %v1923_v8  ;;  %vm381_vm10 = vcmp.eq.s32.totalorder %v2603_v4, %v1880_v49  ;;  %vm539_vm11 = vcmp.eq.s32.totalorder %v2603_v4, %v1883_v50  ;;  %v1148_v49 = vld [vmem:[%s1736_s29] sm:$0xff] }
 0x12b   : > { %1211 = vmatpush2.msra.mxu0 %v1120_v59  ;;  %v1119_v9 = vadd.f32 %v1055_v55, %v902_v15  ;;  %v1054_v33 = vsel %vm979_vm9, %v1892_v58, 0.0  ;;  %v456_v37 = vsel %vm381_vm10, %v1859_v21, 0.0  ;;  %v614_v43 = vsel %vm539_vm11, %v1862_v25, 0.0 }
 0x12c   : > { %v901_v47 = vadd.f32 %v837_v34, %v679_v27  ;;  %v678_v44 = vadd.f32 %v614_v43, %v456_v37  ;;  %vm761_vm12 = vcmp.eq.s32.totalorder %v2603_v4, %v1908_v63  ;;  %vm978_vm13 = vcmp.eq.s32.totalorder %v2603_v4, %v1911_v0 }
 0x12d   : > { %1212 = vmatprep.subr.mxu0 %v1119_v9  ;;  %v836_v50 = vsel %vm761_vm12, %v1868_v41, 0.0  ;;  %v1053_v53 = vsel %vm978_vm13, %v1874_v45, 0.0  ;;  %vm380_vm14 = vcmp.eq.s32.totalorder %v2603_v4, %v1886_v51  ;;  %vm538_vm15 = vcmp.eq.s32.totalorder %v2603_v4, %v1889_v52 }
 0x12e   : > { %v1118_v21 = vadd.f32 %v1054_v33, %v901_v47  ;;  %v900_v25 = vadd.f32 %v836_v50, %v678_v44  ;;  %v455_v57 = vsel %vm380_vm14, %v1865_v29, 0.0  ;;  %v613_v63 = vsel %vm538_vm15, %v1871_v42, 0.0 }
 0x12f   : > { %v677_v0 = vadd.f32 %v613_v63, %v455_v57  ;;  %vm760_vm0 = vcmp.eq.s32.totalorder %v2603_v4, %v1916_v5  ;;  %vm977_vm1 = vcmp.eq.s32.totalorder %v2603_v4, %v1923_v8  ;;  %v1150_v41 = vcombine.high %v1148_v49, %v1148_v49 }
 0x130   : > { %1213 = vmatpush2.msra.mxu0 %v1118_v21  ;;  %v1117_v45 = vadd.f32 %v1053_v53, %v900_v25  ;;  %v835_v51 = vsel %vm760_vm0, %v1877_v48, 0.0  ;;  %v1052_v52 = vsel %vm977_vm1, %v1892_v58, 0.0 }
 0x131   : > { %v899_v29 = vadd.f32 %v835_v51, %v677_v0  ;;  %1216 = vmatprep.mubr.f32.mxu0 %v1150_v41 }
 0x132   : > { %1214 = vmatprep.subr.mxu0 %v1117_v45 }
 0x133   : > { %v1116_v42 = vadd.f32 %v1052_v52, %v899_v29 }
 0x135   : > { %1215 = vmatpush2.msra.mxu0 %v1116_v42 }
 0x136   : > { %1217 = vmatmul.mubr.f32.vlgmr.msra.gmra.mxu0 %v1148_v49 }
 0x1f6   : > { %v1218_v5 = vpop.f32.mrf.mxu0 }
 0x1f8   : > { %v1220_v8 = vpop.f32.mrf.mxu0 }
 0x1f9   : > { %v1225_v28 = vcombine.low %v1218_v5, %v1220_v8 }
 0x1fb   : > { %1227 = vst [vmem:[%s238_s1] sm:$0xff] %v1225_v28 }
 0x1fc   : > { %1514 = shalt.err (!%p1511_p5)
}
 0x1fd   : > { %s1515_s14 = scalar_lea.hbm %s1241_s6, 128  ;;  %s1519_s20 = scalar_lea.hbm %s2703_s4, 256 }
 0x1fe   : > { %p1516_p7 = scmp.ne.s32.totalorder %s1241_s6, %s1515_s14  ;;  %p1520_p12 = scmp.lt.s32.totalorder %s1241_s6, %s2703_s4 }
 0x1ff   : > { %p1521_p9 = scmp.lt.s32.totalorder %s1519_s20, %s1515_s14 }
 0x200   : > { %p1517_p10 = pnand %p1516_p7, %p2733_p3 }
 0x201   : > { %p1522_p4 = por %p1521_p9, %p1520_p12 }
 0x202   : > { %p1518_p6 = pneg %p1517_p10 }
 0x204   : > { %p1523_p8 = pnand %p1522_p4, %p1518_p6 }
 0x206   : > { %1526 = shalt.err (!%p1523_p8)
}
 0x207   : > { %1378 = dma.vmem_to_hbm [thread:$0]  (%p2733_p3), %s1244_s23, 128, %s1241_s6, %s1229_s7  }
 0x208 PF: > { %s1255_s24 = sand.u32 1, %s1561_s15   ;;  %p2734_p11 = scmp.ne.s32.totalorder %s2712_s22, 0 }
 0x209   : > { %p2735_p1 = scmp.ge.s32.totalorder %s1573_s18, 2  ;;  %s1256_s26 = scalar_lea.sflag [#allocation4], %s1255_s24 }
 0x20b   : > { %p1392_p13 = pnand %p2735_p1, %p2734_p11 }
 0x20d   : > { %p1393_p0 = pneg %p1392_p13 }
 0x20f   : > { %1556 = dma.done.wait (%p1393_p0), %s1256_s26, 128  }
 0x210   : > { %1558 = vsyncadd (%p1393_p0), %s1256_s26, 4294967168  ;;  %p19_p2 = scmp.ge.s32.totalorder %s1658_s27, 4   ;;  %s2736_s15 = smov %s1565_s16 }
 0x211   : > { %s2737_s16 = smov %s1569_s17  ;;  %s2738_s17 = smov %s1682_s11 }
 0x212   : > { %s2739_s18 = smov %s1658_s27  ;;  %21 = sbr.rel (!%p19_p2) target bundleno = 10 (0xa), region = 91 }
 0x217   :  { %1261 = vsyncpa [#allocation3], 1 }
 0x218   :  { %1263 = vsyncpa [#allocation3 + $0x1], 1 }
 0x219   :  { %1264 = vsyncpa [#allocation8], 1 }
 0x21a   :  { %1266 = vsyncpa [#allocation8 + $0x1], 1 }
 0x21b   :  { %1267 = vsyncpa [#allocation4], 1 }
 0x21c   :  { %1269 = vsyncpa [#allocation4 + $0x1], 1 }
 0x21d   :  { %1270 = vsyncpa [#allocation5], 1 }
 0x21e   :  { %1272 = vsyncpa [#allocation5 + $0x1], 1 }

</bundles_post_ra>
